<compile_context>
chip_gen: v7x
topology: tpu7x:2x2x1
jax: 0.10.0
libtpu: 0.0.40
codegen_flags: <defaults>
</compile_context>

<pallas_src>
import jax
import jax.numpy as jnp
from jax.experimental import pallas as pl
from jax.experimental.pallas import tpu as pltpu


def _round_up(n, m):
    return ((n + m - 1) // m) * m


def _mlp_kernel(x_ref, w1_ref, b1_ref, w2_ref, b2_ref, o_ref):
    # Layer 1: x @ W1 + b1 (f32 MXU accumulation), exact sigmoid.
    h = jnp.dot(x_ref[...], w1_ref[...],
                preferred_element_type=jnp.float32) + b1_ref[...]
    h = 1.0 / (1.0 + jnp.exp(-h))  # exact divide; kernel is mem-bound, VPU has slack

    # Layer 2: h @ W2 + b2.  W2 is lane-padded to 128 with zero columns and b2
    # padded with -1e30, so padded logits are exactly -1e30 (no in-kernel mask).
    logits = jnp.dot(h.astype(w2_ref.dtype), w2_ref[...],
                     preferred_element_type=jnp.float32) + b2_ref[...]

    # LogSoftmax over dim=1 (numerically stable).  Padded lanes contribute
    # exp(-1e30 - m) == 0 to the normalizer, so the result is exact.
    m = jnp.max(logits, axis=1, keepdims=True)
    shifted = logits - m
    lse = jnp.log(jnp.sum(jnp.exp(shifted), axis=1, keepdims=True))
    out = shifted - lse

    # Store only the real classes; the output HBM array has the true shape.
    o_ref[...] = out[:, :o_ref.shape[1]].astype(o_ref.dtype)


def mnist_mlp_forward(x, w1, b1, w2, b2, *, batch_tile=2048):
    """x: (B, 784) f32 or bf16. w1: (784, 128), b1: (128,), w2: (128, 10), b2: (10,).

    Returns (B, 10) float32 log-probabilities.
    """
    B, D_in = x.shape
    D_hid = w1.shape[1]
    D_out = w2.shape[1]
    D_out_p = _round_up(max(D_out, 128), 128)  # kernel-internal lane padding only

    # Compute dtype follows x.dtype: never cast the dominant x stream here.
    cd = x.dtype

    # Weights/biases are tiny (<0.5 MiB): pad/cast them in the wrapper.
    w1_c = w1.astype(cd)
    b1_c = b1.reshape(1, D_hid).astype(jnp.float32)
    w2_p = jnp.zeros((D_hid, D_out_p), cd).at[:, :D_out].set(w2.astype(cd))
    b2_p = jnp.full((1, D_out_p), -1e30, jnp.float32).at[:, :D_out].set(
        b2.astype(jnp.float32))

    # Batch tile: as large as useful, multiple of 8, no padded copy of x.
    bt = max(8, min(_round_up(batch_tile, 8), _round_up(B, 8)))
    if B > 8 and pl.cdiv(B, bt) < 2:
        # Keep >=2 grid steps so both TensorCores get work on megacore parts.
        bt = max(8, _round_up(pl.cdiv(B, 2), 8))
    grid = (pl.cdiv(B, bt),)  # ragged last block: OOB rows read junk (per-row
                              # independent) and are masked on write-back.

    itemsize = jnp.dtype(cd).itemsize
    est_vmem = (2 * bt * D_in * itemsize                       # double-buffered x
                + 2 * bt * D_out_p * 4                         # out tile (lane layout)
                + 2 * ((D_in + D_out_p) * D_hid * itemsize     # resident weights
                       + (D_hid + D_out_p) * 4))               # resident biases
    vmem_limit = int(min(48 * 2**20, max(32 * 2**20, 3 * est_vmem // 2)))

    cost = pl.CostEstimate(
        flops=2 * B * (D_in * D_hid + D_hid * D_out_p),
        transcendentals=B * (D_hid + D_out_p),
        bytes_accessed=(B * D_in * itemsize
                        + (D_in * D_hid + D_hid * D_out_p) * itemsize
                        + B * D_out * 4),
    )

    return pl.pallas_call(
        _mlp_kernel,
        out_shape=jax.ShapeDtypeStruct((B, D_out), jnp.float32),
        grid_spec=pltpu.PrefetchScalarGridSpec(
            num_scalar_prefetch=0,
            grid=grid,
            in_specs=[
                pl.BlockSpec((bt, D_in), lambda i: (i, 0)),       # x (native shape)
                pl.BlockSpec((D_in, D_hid), lambda i: (0, 0)),    # W1 (resident)
                pl.BlockSpec((1, D_hid), lambda i: (0, 0)),       # b1
                pl.BlockSpec((D_hid, D_out_p), lambda i: (0, 0)), # W2 (lane-padded)
                pl.BlockSpec((1, D_out_p), lambda i: (0, 0)),     # b2 (-1e30 pad)
            ],
            out_specs=pl.BlockSpec((bt, D_out), lambda i: (i, 0)),
        ),
        compiler_params=pltpu.CompilerParams(
            dimension_semantics=("parallel",),   # batch tiles across TCs (v7x)
            vmem_limit_bytes=vmem_limit,
        ),
        cost_estimate=cost,
    )(x, w1_c, b1_c, w2_p, b2_p)


def _init_params(key):
    """Deterministic init mimicking torch.nn.Linear default U[-1/sqrt(fan_in), +1/sqrt(fan_in)]."""
    d_in, d_hid, d_out = 28 * 28, 128, 10
    k1, k2, k3, k4 = jax.random.split(key, 4)
    bound1 = 1.0 / jnp.sqrt(d_in)
    bound2 = 1.0 / jnp.sqrt(d_hid)
    w1 = jax.random.uniform(k1, (d_in, d_hid), jnp.float32, -bound1, bound1)
    b1 = jax.random.uniform(k2, (d_hid,), jnp.float32, -bound1, bound1)
    w2 = jax.random.uniform(k3, (d_hid, d_out), jnp.float32, -bound2, bound2)
    b2 = jax.random.uniform(k4, (d_out,), jnp.float32, -bound2, bound2)
    return w1, b1, w2, b2


def _reference(x, w1, b1, w2, b2):
    h = jax.nn.sigmoid(x.astype(jnp.float32) @ w1 + b1)
    logits = h @ w2 + b2
    return jax.nn.log_softmax(logits, axis=1)


if __name__ == "__main__":
    key = jax.random.PRNGKey(0)
    pkey, xkey = jax.random.split(key)
    w1, b1, w2, b2 = _init_params(pkey)

    # Batch not divisible by the chosen tile -> exercises the ragged last block
    # and the >=2-grid-step (megacore) path.
    B = 200
    x = jax.random.normal(xkey, (B, 28 * 28), jnp.float32)
    ref = _reference(x, w1, b1, w2, b2)

    # f32 path (x stays f32 end-to-end; exact sigmoid -> tight tolerance).
    out_f32 = jax.block_until_ready(mnist_mlp_forward(x, w1, b1, w2, b2))
    assert out_f32.shape == (B, 10)
    assert jnp.allclose(out_f32, ref, atol=2e-3, rtol=2e-3), (
        "f32 mismatch vs JAX reference: max abs err = "
        f"{float(jnp.max(jnp.abs(out_f32 - ref)))}")

    # bf16 path: only exercised with x that is ALREADY bf16 upstream (the
    # wrapper never casts x itself).  f32 MXU accumulation, looser tolerance.
    x_bf16 = x.astype(jnp.bfloat16)
    out_bf16 = jax.block_until_ready(mnist_mlp_forward(x_bf16, w1, b1, w2, b2))
    assert out_bf16.shape == (B, 10)
    assert jnp.allclose(out_bf16, ref, atol=1e-1, rtol=0.0), (
        "bf16 mismatch vs JAX reference: max abs err = "
        f"{float(jnp.max(jnp.abs(out_bf16 - ref)))}")

    print("KERNEL_OK")
</pallas_src>

<mosaic_0001>
module attributes {stable_mosaic.version = 11 : i64} {
  func.func @_mlp_kernel(%arg0: i32, %arg1: memref<104x784xf32, #tpu.memory_space<vmem>>, %arg2: memref<784x128xf32, #tpu.memory_space<vmem>>, %arg3: memref<1x128xf32, #tpu.memory_space<vmem>>, %arg4: memref<128x128xf32, #tpu.memory_space<vmem>>, %arg5: memref<1x128xf32, #tpu.memory_space<vmem>>, %arg6: memref<104x10xf32, #tpu.memory_space<vmem>>) attributes {dimension_semantics = [#tpu.dimension_semantics<parallel>], iteration_bounds = array<i64: 2>, scalar_prefetch = 0 : i64, scratch_operands = 0 : i64, tpu.core_type = #tpu.core_type<tc>, window_params = [{transform_indices = @transform_0, window_bounds = array<i64: 104, 784>}, {pipeline_mode = #tpu.pipeline_mode<synchronous>, transform_indices = @transform_1, window_bounds = array<i64: 784, 128>}, {pipeline_mode = #tpu.pipeline_mode<synchronous>, transform_indices = @transform_2, window_bounds = array<i64: 1, 128>}, {pipeline_mode = #tpu.pipeline_mode<synchronous>, transform_indices = @transform_3, window_bounds = array<i64: 128, 128>}, {pipeline_mode = #tpu.pipeline_mode<synchronous>, transform_indices = @transform_4, window_bounds = array<i64: 1, 128>}, {transform_indices = @transform_5, window_bounds = array<i64: 104, 10>}]} {
    %c0 = arith.constant 0 : index
    %c0_0 = arith.constant 0 : index
    %0 = vector.load %arg1[%c0, %c0_0] : memref<104x784xf32, #tpu.memory_space<vmem>>, vector<104x784xf32>
    %c0_1 = arith.constant 0 : index
    %c0_2 = arith.constant 0 : index
    %1 = vector.load %arg2[%c0_1, %c0_2] : memref<784x128xf32, #tpu.memory_space<vmem>>, vector<784x128xf32>
    %cst = arith.constant dense<0.000000e+00> : vector<104x128xf32>
    %2 = tpu.matmul %0, %1, %cst {dimension_numbers = #tpu.dot_dimension_numbers<[1], [0], [0], [1], [0, 0, 1, 1], [], []>} : vector<104x784xf32>, vector<784x128xf32>, vector<104x128xf32> -> vector<104x128xf32>
    %c0_3 = arith.constant 0 : index
    %c0_4 = arith.constant 0 : index
    %3 = vector.load %arg3[%c0_3, %c0_4] : memref<1x128xf32, #tpu.memory_space<vmem>>, vector<1x128xf32>
    %4 = vector.broadcast %3 : vector<1x128xf32> to vector<104x128xf32>
    %5 = arith.addf %2, %4 : vector<104x128xf32>
    %cst_5 = arith.constant 0.000000e+00 : f32
    %6 = vector.broadcast %cst_5 : f32 to vector<104x128xf32>
    %7 = arith.subf %6, %5 : vector<104x128xf32>
    %8 = math.exp %7 : vector<104x128xf32>
    %cst_6 = arith.constant 1.000000e+00 : f32
    %9 = vector.broadcast %cst_6 : f32 to vector<104x128xf32>
    %10 = arith.addf %9, %8 : vector<104x128xf32>
    %cst_7 = arith.constant 1.000000e+00 : f32
    %11 = vector.broadcast %cst_7 : f32 to vector<104x128xf32>
    %12 = arith.divf %11, %10 : vector<104x128xf32>
    %c0_8 = arith.constant 0 : index
    %c0_9 = arith.constant 0 : index
    %13 = vector.load %arg4[%c0_8, %c0_9] : memref<128x128xf32, #tpu.memory_space<vmem>>, vector<128x128xf32>
    %cst_10 = arith.constant dense<0.000000e+00> : vector<104x128xf32>
    %14 = tpu.matmul %12, %13, %cst_10 {dimension_numbers = #tpu.dot_dimension_numbers<[1], [0], [0], [1], [0, 0, 1, 1], [], []>} : vector<104x128xf32>, vector<128x128xf32>, vector<104x128xf32> -> vector<104x128xf32>
    %c0_11 = arith.constant 0 : index
    %c0_12 = arith.constant 0 : index
    %15 = vector.load %arg5[%c0_11, %c0_12] : memref<1x128xf32, #tpu.memory_space<vmem>>, vector<1x128xf32>
    %16 = vector.broadcast %15 : vector<1x128xf32> to vector<104x128xf32>
    %17 = arith.addf %14, %16 : vector<104x128xf32>
    %cst_13 = arith.constant dense<0xFF800000> : vector<104xf32>
    %18 = vector.multi_reduction <maximumf>, %17, %cst_13 [1] : vector<104x128xf32> to vector<104xf32>
    %19 = vector.shape_cast %18 : vector<104xf32> to vector<104x1xf32>
    %20 = vector.broadcast %19 : vector<104x1xf32> to vector<104x128xf32>
    %21 = arith.subf %17, %20 : vector<104x128xf32>
    %22 = math.exp %21 : vector<104x128xf32>
    %cst_14 = arith.constant dense<0.000000e+00> : vector<104xf32>
    %23 = vector.multi_reduction <add>, %22, %cst_14 [1] : vector<104x128xf32> to vector<104xf32>
    %24 = vector.shape_cast %23 : vector<104xf32> to vector<104x1xf32>
    %25 = math.log %24 : vector<104x1xf32>
    %26 = vector.broadcast %25 : vector<104x1xf32> to vector<104x128xf32>
    %27 = arith.subf %21, %26 : vector<104x128xf32>
    %28 = vector.extract_strided_slice %27 {offsets = [0, 0], sizes = [104, 10], strides = [1, 1]} : vector<104x128xf32> to vector<104x10xf32>
    %c0_15 = arith.constant 0 : index
    %c0_16 = arith.constant 0 : index
    %29 = vector.load %arg6[%c0_15, %c0_16] : memref<104x10xf32, #tpu.memory_space<vmem>>, vector<104x10xf32>
    tpu.vector_store %arg6[%c0_15, %c0_16], %28 {strides = array<i32>} : memref<104x10xf32, #tpu.memory_space<vmem>>, vector<104x10xf32>,
    return
  }
  func.func @transform_0(%arg0: i32) -> (i32, i32) {
    %c0_i32 = arith.constant 0 : i32
    %c0_i32_0 = arith.constant 0 : i32
    return %arg0, %c0_i32 : i32, i32
  }
  func.func @transform_1(%arg0: i32) -> (i32, i32) {
    %c0_i32 = arith.constant 0 : i32
    %c0_i32_0 = arith.constant 0 : i32
    %c0_i32_1 = arith.constant 0 : i32
    return %c0_i32, %c0_i32_0 : i32, i32
  }
  func.func @transform_2(%arg0: i32) -> (i32, i32) {
    %c0_i32 = arith.constant 0 : i32
    %c0_i32_0 = arith.constant 0 : i32
    %c0_i32_1 = arith.constant 0 : i32
    return %c0_i32, %c0_i32_0 : i32, i32
  }
  func.func @transform_3(%arg0: i32) -> (i32, i32) {
    %c0_i32 = arith.constant 0 : i32
    %c0_i32_0 = arith.constant 0 : i32
    %c0_i32_1 = arith.constant 0 : i32
    return %c0_i32, %c0_i32_0 : i32, i32
  }
  func.func @transform_4(%arg0: i32) -> (i32, i32) {
    %c0_i32 = arith.constant 0 : i32
    %c0_i32_0 = arith.constant 0 : i32
    %c0_i32_1 = arith.constant 0 : i32
    return %c0_i32, %c0_i32_0 : i32, i32
  }
  func.func @transform_5(%arg0: i32) -> (i32, i32) {
    %c0_i32 = arith.constant 0 : i32
    %c0_i32_0 = arith.constant 0 : i32
    return %arg0, %c0_i32 : i32, i32
  }
}

</mosaic_0001>

<bundles_post_ra>
// kernel: tpu_custom_call.1
= control target key start
LH: loop header
LB: loop body
LE: loop exit
PB: predicated region body
PF: predicated region fallthrough
CT: control target
= control target key end

     0   :  { %10 = vsyncpa [#allocation3], 0  ;;  %s3328_s0 = inlined_call_operand.hbm [shape: f32[200,784], index: 0, kind: input, shape index: {}]   ;;  %s3329_s1 = inlined_call_operand.hbm [shape: f32[784,128], index: 1, kind: input, shape index: {}]   ;;  %s3330_s2 = inlined_call_operand.vmem [shape: f32[1,128], index: 2, kind: input, shape index: {}]   ;;  %s3331_s3 = inlined_call_operand.hbm [shape: f32[128,128], index: 3, kind: input, shape index: {}]   ;;  %s3332_s4 = inlined_call_operand.vmem [shape: f32[1,128], index: 4, kind: input, shape index: {}]   ;;  %s3333_s5 = inlined_call_operand.vmem [shape: f32[200,10], index: 5, kind: output, shape index: {}]  }
   0x1   :  { %12 = vsyncpa [#allocation3 + $0x1], 0 }
   0x2   :  { %13 = vsyncpa [#allocation5], 0  ;;  %s2731_s18 = smov 0   ;;  %s2733_s19 = smov 0  }
   0x3   :  { %s2735_s20 = smov 0   ;;  %s2737_s21 = smov 0  }
   0x4 LB: > { %s2750_s22 = sadd.s32 4294967295, %s2657_s21   ;;  %s2753_s23 = sadd.s32 1, %s2657_s21   ;;  %s2657_s21 = sphi %s2737_s21, %s3354_s21   ;;  %s2653_s20 = sphi %s2735_s20, %s3353_s20   ;;  %s2649_s19 = sphi %s2733_s19, %s3352_s19   ;;  %s2645_s18 = sphi %s2731_s18, %s3351_s18  }
   0x5   : > { %s23_s24 = ssub.s32 %s2657_s21, %s2753_s23  ;;  %s26_s25 = sadd.s32 1, %s2653_s20 }
   0x6   : > { %p24_p0 = scmp.eq.s32.totalorder %s23_s24, 0  ;;  %p33_p1 = scmp.ne.s32.totalorder %s2653_s20, %s2649_s19 }
   0x7   : > { %p34_p2 = scmp.eq.s32.totalorder %s2657_s21, 0  ;;  %p39_p3 = scmp.ne.s32.totalorder %s2649_s19, %s2645_s18 }
   0x8   : > { %s2763_s26 = scalar_select %p24_p0, %s2653_s20, %s26_s25  }
   0x9   : > { %p2765_p4 = por %p34_p2, %p33_p1  ;;  %p3334_p5 = scmp.eq.s32.totalorder %s2750_s22, 0 }
   0xa   : > { %p147_p6 = scmp.eq.s32.totalorder %s2750_s22, 1  ;;  %p1714_p7 = scmp.ge.s32.totalorder %s2657_s21, 1 }
   0xb   : > { %s3337_s27 = scalar_select %p2765_p4, 1, 0 }
   0xc   : > { %p2774_p8 = por %p3334_p5, %p39_p3  ;;  %p160_p9 = scmp.lt.s32.totalorder %s2657_s21, 3 }
   0xd   : > { %p2779_p10 = por %p147_p6, %p33_p1  ;;  %s2691_s6 = smov [#allocation4]  }
   0xe   : > { %s3338_s28 = scalar_select %p2774_p8, 1, 0 }
   0xf   : > { %s3339_s29 = scalar_select %p2779_p10, 1, 0 }
  0x10   : > { %p2783_p11 = pnand %p1714_p7, %p160_p9  ;;  %s172_s7 = sshll.u32 %s2691_s6, 4  ;;  %s173_s7 = int_to_ptr.vmem [resolvable:$true] %s172_s7 }
  0x11   : > { %s2692_s9 = smov [#allocation6]   ;;  %s2503_s13 = scalar_lea.hbm %s3329_s1, 12544 }
  0x12   : > { %s3340_s30 = scalar_select %p2783_p11, 1, 0 }
  0x13   : > { %p2277_p12 = pneg %p2783_p11  ;;  %s188_s10 = sshll.u32 %s2692_s9, 4  ;;  %s2795_s10 = int_to_ptr.vmem [resolvable:$true] %s188_s10 }
  0x14   : > { %p2504_p0 = scmp.ne.s32.totalorder %s3329_s1, %s2503_s13  ;;  %p2510_p6 = scmp.lt.u32.totalorder %s2503_s13, %s3329_s1 }
  0x15   : > { %p2791_p13 = pnand %p2277_p12, %p3334_p5 }
  0x17   : > { %p2505_p1 = pneg %p2791_p13 }
  0x19   : > { %p2506_p2 = pnand %p2505_p1, %p2504_p0 }
  0x1b   : > { %p2507_p3 = pneg %p2506_p2 }
  0x1d   : > { %p2512_p7 = pnand %p2510_p6, %p2507_p3 }
  0x1f   : > { %2515 = shalt.err (!%p2512_p7)
}
  0x20   : > { %s2516_s18 = scalar_lea.vmem %s173_s7, 12544  ;;  %p2524_p10 = scmp.lt.s32.totalorder %s173_s7, %s173_s7 }
  0x21   : > { %p2517_p9 = scmp.ne.s32.totalorder %s173_s7, %s2516_s18  ;;  %p2525_p8 = scmp.lt.s32.totalorder %s2516_s18, %s2516_s18 }
  0x23   : > { %p2519_p12 = pnand %p2517_p9, %p2505_p1  ;;  %p2526_p11 = por %p2525_p8, %p2524_p10 }
  0x25   : > { %p2520_p5 = pneg %p2519_p12 }
  0x27   : > { %p2527_p4 = pnand %p2526_p11, %p2520_p5 }
  0x29   : > { %2530 = shalt.err (!%p2527_p4)
}
  0x2a   : > { %s2693_s24 = smov 128   ;;  %s2694_s25 = smov 8  }
  0x2b   : > { %2280 = dma.hbm_to_vmem [thread:$0]  (!%p2791_p13), %s3329_s1, 12544, %s173_s7, [#allocation5], %s2693_s24, %s2693_s24, %s2694_s25  }
  0x2c   : > { %s2531_s13 = scalar_lea.hbm %s3331_s3, 2048 }
  0x2d   : > { %p2532_p0 = scmp.ne.s32.totalorder %s3331_s3, %s2531_s13  ;;  %p2538_p8 = scmp.lt.u32.totalorder %s2531_s13, %s3331_s3 }
  0x2f   : > { %p2534_p4 = pnand %p2532_p0, %p2505_p1 }
  0x31   : > { %p2535_p5 = pneg %p2534_p4 }
  0x33   : > { %p2540_p10 = pnand %p2538_p8, %p2535_p5 }
  0x35   : > { %2543 = shalt.err (!%p2540_p10)
}
  0x36   : > { %s2544_s7 = scalar_lea.vmem %s2795_s10, 2048  ;;  %p2552_p6 = scmp.lt.s32.totalorder %s2795_s10, %s2795_s10 }
  0x37   : > { %p2545_p11 = scmp.ne.s32.totalorder %s2795_s10, %s2544_s7  ;;  %p2553_p7 = scmp.lt.s32.totalorder %s2544_s7, %s2544_s7 }
  0x39   : > { %p2547_p2 = pnand %p2545_p11, %p2505_p1  ;;  %p2554_p9 = por %p2553_p7, %p2552_p6 }
  0x3b   : > { %p2548_p3 = pneg %p2547_p2 }
  0x3d   : > { %p2555_p12 = pnand %p2554_p9, %p2548_p3 }
  0x3f   : > { %2558 = shalt.err (!%p2555_p12)
}
  0x40   : > { %2283 = dma.hbm_to_vmem [thread:$0]  (!%p2791_p13), %s3331_s3, 2048, %s2795_s10, [#allocation5], %s2693_s24, %s2693_s24, %s2694_s25  }
  0x41   : > { %p1717_p0 = scmp.ge.s32.totalorder %s2657_s21, 2 }
  0x42   : > { %p3342_p4 = scmp.ne.s32.totalorder (!%p1717_p0), %s3337_s27, 0 }
  0x43   : > { %201 = sbr.rel (%p1717_p0) target bundleno = 110 (0x6e), region = 32 }
  0x4a   : > { %204 = sbr.rel (!%p3342_p4) target bundleno = 110 (0x6e), region = 36  ;;  %s205_s9 = sand.u32 (%p3342_p4), 1, %s2653_s20  }
  0x4b   : > { %s210_s11 = smul.u32 (%p3342_p4), 13, %s2657_s21  ;;  %s2852_s15 = scalar_lea.sflag (%p3342_p4), [#allocation3], %s205_s9 }
  0x4c   : > { %s2264_s12 = smul.u32 (%p3342_p4), 728, %s205_s9 }
  0x4d   : > { %s211_s13 = ssub.s32 (%p3342_p4), 25, %s210_s11 }
  0x4e   : > { %p212_p1 = scmp.lt.s32.totalorder (%p3342_p4), %s211_s13, 13  ;;  %s209_s10 = scalar_lea.vmem (%p3342_p4), [#allocation2], %s2264_s12 }
  0x51   : > { %s3356_s13 = smov (!%p212_p1, %s211_s13), 13 }
  0x52   : > { %s2849_s8 = smul.u32 896, %s3356_s13 }
  0x54   : > { %s217_s14 = ssub.s32 11648, %s2849_s8 }
  0x55   : > { %218 = vsyncadd %s2852_s15, %s217_s14  ;;  %p1720_p13 = scmp.ne.s32.totalorder %s2849_s8, 0  ;;  %s2286_s27 = smul.u32 11648, %s2657_s21 }
  0x56   : > { %s224_s24 = sshll.u32 %s209_s10, 4  ;;  %s2563_s21 = scalar_lea.hbm %s3328_s0, 22400  ;;  %s2862_s24 = int_to_ptr.vmem [resolvable:$true] %s224_s24 }
  0x57   : > { %s2860_s17 = scalar_lea.hbm %s3328_s0, %s2286_s27 }
  0x58   : > { %s2559_s7 = scalar_lea.hbm %s2860_s17, %s2849_s8  ;;  %p2564_p11 = scmp.lt.u32.totalorder %s2860_s17, %s3328_s0 }
  0x59   : > { %p2560_p5 = scmp.ne.s32.totalorder %s2860_s17, %s2559_s7  ;;  %p2565_p2 = scmp.lt.u32.totalorder %s2563_s21, %s2559_s7 }
  0x5a   : > { %p2567_p6 = scmp.lt.u32.totalorder %s2559_s7, %s2860_s17 }
  0x5b   : > { %p2561_p8 = pnand %p2560_p5, %p1720_p13  ;;  %p2566_p3 = por %p2565_p2, %p2564_p11 }
  0x5d   : > { %p2562_p10 = pneg %p2561_p8  ;;  %p2568_p7 = por %p2567_p6, %p2566_p3 }
  0x5f   : > { %p2569_p9 = pnand %p2568_p7, %p2562_p10 }
  0x61   : > { %2572 = shalt.err (!%p2569_p9)
}
  0x62   : > { %s2573_s12 = scalar_lea.vmem %s2862_s24, %s2849_s8  ;;  %s2695_s13 = smov [#allocation2]  }
  0x63   : > { %p2574_p12 = scmp.ne.s32.totalorder %s2862_s24, %s2573_s12  ;;  %s2577_s14 = sshll.u32 %s2695_s13, 4  ;;  %s2578_s14 = int_to_ptr.vmem [resolvable:$false] %s2577_s14 }
  0x64   : > { %s2579_s10 = scalar_lea.vmem %s2578_s14, 23296  ;;  %p2580_p1 = scmp.lt.s32.totalorder %s2862_s24, %s2578_s14 }
  0x65   : > { %p2575_p0 = pnand %p2574_p12, %p1720_p13  ;;  %p2581_p5 = scmp.lt.s32.totalorder %s2579_s10, %s2573_s12 }
  0x67   : > { %p2576_p4 = pneg %p2575_p0  ;;  %p2582_p8 = por %p2581_p5, %p2580_p1 }
  0x69   : > { %p2583_p11 = pnand %p2582_p8, %p2576_p4 }
  0x6b   : > { %2586 = shalt.err (!%p2583_p11)
}
  0x6c   : > { %s2696_s27 = smov 896   ;;  %s2697_s25 = smov 56  }
  0x6d   : > { %230 = dma.hbm_to_vmem [thread:$0]  (%p1720_p13), %s2860_s17, %s2849_s8, %s2862_s24, %s2852_s15, %s2696_s27, %s2696_s27, %s2697_s25  }
  0x6e PF: > { %p3343_p10 = scmp.ne.s32.totalorder %s3340_s30, 0 }
  0x6f   : > { %s2892_s16 = sand.u32 (!%p3343_p10), 1, %s2649_s19   ;;  %p3344_p2 = scmp.ne.s32.totalorder (!%p3343_p10), %s3338_s28, 0 }
  0x70   : > { %236 = sbr.rel (%p3343_p10) target bundleno = 1095 (0x447), region = 40  ;;  %s239_s18 = scalar_lea.sflag (!%p3343_p10), [#allocation3], %s2892_s16 }
  0x71   : > { %s2266_s7 = smul.u32 (!%p3343_p10), 728, %s2892_s16 }
  0x73   : > { %s2896_s6 = scalar_lea.vmem (!%p3343_p10), [#allocation2], %s2266_s7 }
  0x77   : > { %2636 = dma.done.wait (%p3344_p2), %s239_s18, 11648  }
  0x78   : > { %2638 = vsyncadd (%p3344_p2), %s239_s18, 4294955648  ;;  %p3345_p13 = scmp.eq.s32.totalorder %s2750_s22, 0 }
  0x7a   : > { %2640 = dma.done.wait (%p3345_p13), [#allocation5], 14592   ;;  %p3346_p3 = pmov %p3345_p13 }
  0x7b   : > { %v394_v0 = vld [vmem:[#allocation4 + $0x80] sm:$0xff]  ;;  %v395_v1 = vld [vmem:[#allocation4 + $0x88] sm:$0xff]  ;;  %v396_v11 = vld [vmem:[#allocation4 + $0x90] sm:$0xff]  ;;  %vm2699_vm0 = vmmov 0   ;;  %vm483_vm1 = vcmask 130048   ;;  %s2267_s24 = smul.u32 104, %s2892_s16 }
  0x7c   : > { %2642 = vsyncadd (%p3346_p3), [#allocation5], 4294952704  ;;  %v378_v2 = vld [vmem:[#allocation4] sm:$0xff]  ;;  %v2125_v3 = vpack.c.bf16 %v395_v1, %v394_v0  ;;  %v379_v4 = vld [vmem:[#allocation4 + $0x8] sm:$0xff]  ;;  %vm1404_vm2 = vcmask 80896   ;;  %p3347_p6 = scmp.ne.s32.totalorder %s3339_s29, 0 }
  0x7d   : > { %v426_v5 = vld [vmem:[#allocation4 + $0x180] sm:$0xff]  ;;  %v427_v6 = vld [vmem:[#allocation4 + $0x188] sm:$0xff]  ;;  %v2127_v7 = vpack.c.bf16 %v379_v4, %v378_v2  ;;  %v397_v13 = vld [vmem:[#allocation4 + $0x98] sm:$0xff]  ;;  %s3196_s17 = scalar_lea.vmem [#allocation7], %s2267_s24   ;;  %s1425_s21 = smul.u32 (%p3347_p6), 13, %s2750_s22 }
  0x7e   : > { %v2157_v8 = vpack.c.bf16 %v427_v6, %v426_v5  ;;  %v410_v9 = vld [vmem:[#allocation4 + $0x100] sm:$0xff]  ;;  %v411_v10 = vld [vmem:[#allocation4 + $0x108] sm:$0xff]  ;;  %2126 = vmatprep.subr.bf16.mxu0 %v2125_v3  ;;  %v380_v14 = vld [vmem:[#allocation4 + $0x10] sm:$0xff]  ;;  %v2129_v16 = vpack.c.bf16 %v397_v13, %v396_v11  ;;  %s1753_s9 = smul.u32 (%p3347_p6), 104, %s2750_s22 }
  0x7f   : > { %v2159_v12 = vpack.c.bf16 %v411_v10, %v410_v9  ;;  %v381_v15 = vld [vmem:[#allocation4 + $0x18] sm:$0xff]  ;;  %2128 = vmatpush3.bf16.msra.mxu0 %v2127_v7  ;;  %v428_v18 = vld [vmem:[#allocation4 + $0x190] sm:$0xff]  ;;  %v398_v23 = vld [vmem:[#allocation4 + $0xa0] sm:$0xff]  ;;  %s1426_s11 = ssub.s32 (%p3347_p6), 25, %s1425_s21 }
  0x80   : > { %2158 = vmatprep.subr.bf16.mxu1 %v2157_v8  ;;  %v2131_v17 = vpack.c.bf16 %v381_v15, %v380_v14  ;;  %v429_v19 = vld [vmem:[#allocation4 + $0x198] sm:$0xff]  ;;  %v412_v20 = vld [vmem:[#allocation4 + $0x110] sm:$0xff]  ;;  %v399_v24 = vld [vmem:[#allocation4 + $0xa8] sm:$0xff]  ;;  %2130 = vmatprep.subr.bf16.mxu0 %v2129_v16  ;;  %p1427_p7 = scmp.lt.s32.totalorder (%p3347_p6), %s1426_s11, 13  ;;  %s3243_s14 = scalar_lea.vmem (%p3347_p6), %s3333_s5, %s1753_s9  }
  0x81   : > { %2160 = vmatpush3.bf16.msra.mxu1 %v2159_v12  ;;  %v2161_v21 = vpack.c.bf16 %v429_v19, %v428_v18  ;;  %v413_v22 = vld [vmem:[#allocation4 + $0x118] sm:$0xff]  ;;  %v2133_v26 = vpack.c.bf16 %v399_v24, %v398_v23  ;;  %v382_v27 = vld [vmem:[#allocation4 + $0x20] sm:$0xff]  ;;  %v383_v28 = vld [vmem:[#allocation4 + $0x28] sm:$0xff] }
  0x82   : > { %v2163_v25 = vpack.c.bf16 %v413_v22, %v412_v20  ;;  %v430_v29 = vld [vmem:[#allocation4 + $0x1a0] sm:$0xff]  ;;  %v431_v30 = vld [vmem:[#allocation4 + $0x1a8] sm:$0xff]  ;;  %v2135_v33 = vpack.c.bf16 %v383_v28, %v382_v27  ;;  %v400_v35 = vld [vmem:[#allocation4 + $0xb0] sm:$0xff] }
  0x83   : > { %2162 = vmatprep.subr.bf16.mxu1 %v2161_v21  ;;  %v414_v31 = vld [vmem:[#allocation4 + $0x120] sm:$0xff]  ;;  %v415_v32 = vld [vmem:[#allocation4 + $0x128] sm:$0xff]  ;;  %2132 = vmatpush3.bf16.msra.mxu0 %v2131_v17  ;;  %v2165_v34 = vpack.c.bf16 %v431_v30, %v430_v29  ;;  %v401_v36 = vld [vmem:[#allocation4 + $0xb8] sm:$0xff] }
  0x84   : > { %v384_v37 = vld [vmem:[#allocation4 + $0x30] sm:$0xff]  ;;  %2134 = vmatprep.subr.bf16.mxu0 %v2133_v26  ;;  %v2167_v38 = vpack.c.bf16 %v415_v32, %v414_v31  ;;  %v2137_v39 = vpack.c.bf16 %v401_v36, %v400_v35  ;;  %v385_v40 = vld [vmem:[#allocation4 + $0x38] sm:$0xff]  ;;  %v402_v46 = vld [vmem:[#allocation4 + $0xc0] sm:$0xff] }
  0x85   : > { %2164 = vmatpush3.bf16.msra.mxu1 %v2163_v25  ;;  %v432_v41 = vld [vmem:[#allocation4 + $0x1b0] sm:$0xff]  ;;  %v433_v42 = vld [vmem:[#allocation4 + $0x1b8] sm:$0xff]  ;;  %v403_v47 = vld [vmem:[#allocation4 + $0xc8] sm:$0xff]  ;;  %v2139_v48 = vpack.c.bf16 %v385_v40, %v384_v37 }
  0x86   : > { %2166 = vmatprep.subr.bf16.mxu1 %v2165_v34  ;;  %v2169_v43 = vpack.c.bf16 %v433_v42, %v432_v41  ;;  %v416_v44 = vld [vmem:[#allocation4 + $0x130] sm:$0xff]  ;;  %v417_v45 = vld [vmem:[#allocation4 + $0x138] sm:$0xff]  ;;  %v434_v49 = vld [vmem:[#allocation4 + $0x1c0] sm:$0xff]  ;;  %v2141_v52 = vpack.c.bf16 %v403_v47, %v402_v46 }
  0x87   : > { %2136 = vmatpush3.bf16.msra.mxu0 %v2135_v33  ;;  %v435_v50 = vld [vmem:[#allocation4 + $0x1c8] sm:$0xff]  ;;  %v2171_v51 = vpack.c.bf16 %v417_v45, %v416_v44  ;;  %v386_v53 = vld [vmem:[#allocation4 + $0x40] sm:$0xff]  ;;  %v404_v58 = vld [vmem:[#allocation4 + $0xd0] sm:$0xff] }
  0x88   : > { %2138 = vmatprep.subr.bf16.mxu0 %v2137_v39  ;;  %v387_v54 = vld [vmem:[#allocation4 + $0x48] sm:$0xff]  ;;  %v418_v55 = vld [vmem:[#allocation4 + $0x140] sm:$0xff]  ;;  %v2173_v56 = vpack.c.bf16 %v435_v50, %v434_v49  ;;  %v405_v59 = vld [vmem:[#allocation4 + $0xd8] sm:$0xff] }
  0x89   : > { %2168 = vmatpush3.bf16.msra.mxu1 %v2167_v38  ;;  %v419_v57 = vld [vmem:[#allocation4 + $0x148] sm:$0xff]  ;;  %v436_v60 = vld [vmem:[#allocation4 + $0x1d0] sm:$0xff]  ;;  %v437_v61 = vld [vmem:[#allocation4 + $0x1d8] sm:$0xff]  ;;  %v2143_v62 = vpack.c.bf16 %v387_v54, %v386_v53  ;;  %v2145_v0 = vpack.c.bf16 %v405_v59, %v404_v58 }
  0x8a   : > { %2170 = vmatprep.subr.bf16.mxu1 %v2169_v43  ;;  %v2175_v63 = vpack.c.bf16 %v419_v57, %v418_v55  ;;  %v388_v1 = vld [vmem:[#allocation4 + $0x50] sm:$0xff]  ;;  %v389_v2 = vld [vmem:[#allocation4 + $0x58] sm:$0xff]  ;;  %v2177_v4 = vpack.c.bf16 %v437_v61, %v436_v60  ;;  %v406_v6 = vld [vmem:[#allocation4 + $0xe0] sm:$0xff] }
  0x8b   : > { %2140 = vmatpush3.bf16.msra.mxu0 %v2139_v48  ;;  %v420_v3 = vld [vmem:[#allocation4 + $0x150] sm:$0xff]  ;;  %v421_v5 = vld [vmem:[#allocation4 + $0x158] sm:$0xff]  ;;  %v407_v7 = vld [vmem:[#allocation4 + $0xe8] sm:$0xff]  ;;  %v2147_v10 = vpack.c.bf16 %v389_v2, %v388_v1  ;;  %v2698_v48 = vmov 0.0|0.0  }
  0x8c   : > { %2142 = vmatprep.subr.bf16.mxu0 %v2141_v52  ;;  %v438_v8 = vld [vmem:[#allocation4 + $0x1e0] sm:$0xff]  ;;  %v439_v9 = vld [vmem:[#allocation4 + $0x1e8] sm:$0xff]  ;;  %v288_v12 = vld [vmem:[%s2896_s6 + $0x8] sm:$0xff]  ;;  %v2179_v13 = vpack.c.bf16 %v421_v5, %v420_v3  ;;  %v2149_v14 = vpack.c.bf16 %v407_v7, %v406_v6 }
  0x8d   : > { %2172 = vmatpush3.bf16.msra.mxu1 %v2171_v51  ;;  %v390_v11 = vld [vmem:[#allocation4 + $0x60] sm:$0xff]  ;;  %v391_v15 = vld [vmem:[#allocation4 + $0x68] sm:$0xff]  ;;  %v2181_v18 = vpack.c.bf16 %v439_v9, %v438_v8  ;;  %v408_v19 = vld [vmem:[#allocation4 + $0xf0] sm:$0xff]  ;;  %587 = vmatprep.mubr.f32.mxu0 %v288_v12 }
  0x8e   : > { %2174 = vmatprep.subr.bf16.mxu1 %v2173_v56  ;;  %v422_v16 = vld [vmem:[#allocation4 + $0x160] sm:$0xff]  ;;  %v423_v17 = vld [vmem:[#allocation4 + $0x168] sm:$0xff]  ;;  %v409_v20 = vld [vmem:[#allocation4 + $0xf8] sm:$0xff]  ;;  %v2151_v24 = vpack.c.bf16 %v391_v15, %v390_v11 }
  0x8f   : > { %2144 = vmatpush3.bf16.msra.mxu0 %v2143_v62  ;;  %v290_v21 = vld [vmem:[%s2896_s6 + $0x18] sm:$0xff]  ;;  %v440_v22 = vld [vmem:[#allocation4 + $0x1f0] sm:$0xff]  ;;  %v441_v23 = vld [vmem:[#allocation4 + $0x1f8] sm:$0xff]  ;;  %v2183_v25 = vpack.c.bf16 %v423_v17, %v422_v16  ;;  %v2153_v26 = vpack.c.bf16 %v409_v20, %v408_v19 }
  0x90   : > { %2146 = vmatprep.subr.bf16.mxu0 %v2145_v0  ;;  %717 = vmatprep.mubr.f32.mxu1 %v290_v21  ;;  %v392_v27 = vld [vmem:[#allocation4 + $0x70] sm:$0xff]  ;;  %v393_v28 = vld [vmem:[#allocation4 + $0x78] sm:$0xff]  ;;  %v2185_v30 = vpack.c.bf16 %v441_v23, %v440_v22  ;;  %v458_v32 = vld [vmem:[#allocation4 + $0x280] sm:$0xff] }
  0x91   : > { %2176 = vmatpush3.bf16.msra.mxu1 %v2175_v63  ;;  %v424_v29 = vld [vmem:[#allocation4 + $0x170] sm:$0xff]  ;;  %v425_v31 = vld [vmem:[#allocation4 + $0x178] sm:$0xff]  ;;  %v459_v33 = vld [vmem:[#allocation4 + $0x288] sm:$0xff]  ;;  %v2155_v34 = vpack.c.bf16 %v393_v28, %v392_v27 }
  0x92   : > { %2178 = vmatprep.subr.bf16.mxu1 %v2177_v4  ;;  %v2187_v35 = vpack.c.bf16 %v425_v31, %v424_v29  ;;  %v2189_v36 = vpack.c.bf16 %v459_v33, %v458_v32  ;;  %v442_v37 = vld [vmem:[#allocation4 + $0x200] sm:$0xff]  ;;  %v443_v38 = vld [vmem:[#allocation4 + $0x208] sm:$0xff]  ;;  %v460_v41 = vld [vmem:[#allocation4 + $0x290] sm:$0xff] }
  0x93   : > { %2148 = vmatpush3.bf16.msra.mxu0 %v2147_v10  ;;  %v474_v39 = vld [vmem:[#allocation4 + $0x300] sm:$0xff]  ;;  %v475_v40 = vld [vmem:[#allocation4 + $0x308] sm:$0xff]  ;;  %v461_v42 = vld [vmem:[#allocation4 + $0x298] sm:$0xff]  ;;  %v2191_v44 = vpack.c.bf16 %v443_v38, %v442_v37 }
  0x94   : > { %2150 = vmatprep.subr.bf16.mxu0 %v2149_v14  ;;  %v287_v43 = vld [vmem:[%s2896_s6] sm:$0xff]  ;;  %v289_v45 = vld [vmem:[%s2896_s6 + $0x10] sm:$0xff]  ;;  %v2222_v49 = vpack.c.bf16 %v475_v40, %v474_v39  ;;  %v2193_v50 = vpack.c.bf16 %v461_v42, %v460_v41  ;;  %v294_v55 = vld [vmem:[%s2896_s6 + $0x38] sm:$0xff] }
  0x95   : > { %2180 = vmatpush3.bf16.msra.mxu1 %v2179_v13  ;;  %v295_v46 = vld [vmem:[%s2896_s6 + $0x40] sm:$0xff]  ;;  %v297_v47 = vld [vmem:[%s2896_s6 + $0x50] sm:$0xff]  ;;  %v296_v56 = vld [vmem:[%s2896_s6 + $0x48] sm:$0xff] }
  0x96   : > { %2182 = vmatprep.subr.bf16.mxu1 %v2181_v18  ;;  %v444_v51 = vld [vmem:[#allocation4 + $0x210] sm:$0xff]  ;;  %v445_v52 = vld [vmem:[#allocation4 + $0x218] sm:$0xff]  ;;  %v462_v53 = vld [vmem:[#allocation4 + $0x2a0] sm:$0xff] }
  0x97   : > { %2152 = vmatpush3.bf16.msra.mxu0 %v2151_v24  ;;  %v463_v54 = vld [vmem:[#allocation4 + $0x2a8] sm:$0xff]  ;;  %v2195_v58 = vpack.c.bf16 %v445_v52, %v444_v51  ;;  %v304_v59 = vld [vmem:[%s2896_s6 + $0x88] sm:$0xff]  ;;  %v446_v61 = vld [vmem:[#allocation4 + $0x220] sm:$0xff] }
  0x98   : > { %2154 = vmatprep.subr.bf16.mxu0 %v2153_v26  ;;  %v302_v57 = vld [vmem:[%s2896_s6 + $0x78] sm:$0xff]  ;;  %v2197_v60 = vpack.c.bf16 %v463_v54, %v462_v53  ;;  %v464_v63 = vld [vmem:[#allocation4 + $0x2b0] sm:$0xff]  ;;  %v465_v0 = vld [vmem:[#allocation4 + $0x2b8] sm:$0xff] }
  0x99   : > { %2184 = vmatpush3.bf16.msra.mxu1 %v2183_v25  ;;  %v447_v62 = vld [vmem:[#allocation4 + $0x228] sm:$0xff]  ;;  %v301_v1 = vld [vmem:[%s2896_s6 + $0x70] sm:$0xff]  ;;  %v2201_v6 = vpack.c.bf16 %v465_v0, %v464_v63  ;;  %v448_v7 = vld [vmem:[#allocation4 + $0x230] sm:$0xff] }
  0x9a   : > { %2186 = vmatprep.subr.bf16.mxu1 %v2185_v30  ;;  %v303_v2 = vld [vmem:[%s2896_s6 + $0x80] sm:$0xff]  ;;  %v309_v3 = vld [vmem:[%s2896_s6 + $0xb0] sm:$0xff]  ;;  %v2199_v4 = vpack.c.bf16 %v447_v62, %v446_v61  ;;  %v308_v11 = vld [vmem:[%s2896_s6 + $0xa8] sm:$0xff] }
  0x9b   : > { %2156 = vmatpush3.bf16.msra.mxu0 %v2155_v34  ;;  %v311_v5 = vld [vmem:[%s2896_s6 + $0xc0] sm:$0xff]  ;;  %v449_v8 = vld [vmem:[#allocation4 + $0x238] sm:$0xff]  ;;  %v466_v9 = vld [vmem:[#allocation4 + $0x2c0] sm:$0xff] }
  0x9c   : > { %2190 = vmatprep.subr.bf16.mxu0 %v2189_v36  ;;  %v467_v10 = vld [vmem:[#allocation4 + $0x2c8] sm:$0xff]  ;;  %v316_v13 = vld [vmem:[%s2896_s6 + $0xe8] sm:$0xff]  ;;  %v2203_v14 = vpack.c.bf16 %v449_v8, %v448_v7  ;;  %v450_v17 = vld [vmem:[#allocation4 + $0x240] sm:$0xff] }
  0x9d   : > { %2188 = vmatpush3.bf16.msra.mxu1 %v2187_v35  ;;  %v310_v12 = vld [vmem:[%s2896_s6 + $0xb8] sm:$0xff]  ;;  %v2205_v16 = vpack.c.bf16 %v467_v10, %v466_v9  ;;  %v468_v19 = vld [vmem:[#allocation4 + $0x2d0] sm:$0xff]  ;;  %v469_v20 = vld [vmem:[#allocation4 + $0x2d8] sm:$0xff] }
  0x9e   : > { %2221 = vmatprep.subr.bf16.mxu1 %v2698_v48  ;;  %588 = vmatmul.mubr.f32.vlgmr.msra.gmra.mrb[0].mxu0 %v287_v43  ;;  %v318_v15 = vld [vmem:[%s2896_s6 + $0xf8] sm:$0xff]  ;;  %v315_v21 = vld [vmem:[%s2896_s6 + $0xe0] sm:$0xff]  ;;  %v317_v22 = vld [vmem:[%s2896_s6 + $0xf0] sm:$0xff]  ;;  %v2209_v26 = vpack.c.bf16 %v469_v20, %v468_v19 }
  0x9f   : > { %2192 = vmatpush3.bf16.msra.mxu0 %v2191_v44  ;;  %592 = vmatprep.mubr.f32.mxu0 %v295_v46  ;;  %v451_v18 = vld [vmem:[#allocation4 + $0x248] sm:$0xff]  ;;  %v325_v25 = vld [vmem:[%s2896_s6 + $0x130] sm:$0xff]  ;;  %v452_v27 = vld [vmem:[#allocation4 + $0x250] sm:$0xff] }
  0xa0   : > { %718 = vmatmul.mubr.f32.vlgmr.msra.gmra.mrb[0].mxu1 %v289_v45  ;;  %2194 = vmatprep.subr.bf16.mxu0 %v2193_v50  ;;  %v323_v23 = vld [vmem:[%s2896_s6 + $0x120] sm:$0xff]  ;;  %v2207_v24 = vpack.c.bf16 %v451_v18, %v450_v17  ;;  %v453_v28 = vld [vmem:[#allocation4 + $0x258] sm:$0xff]  ;;  %v470_v29 = vld [vmem:[#allocation4 + $0x2e0] sm:$0xff] }
  0xa1   : > { %722 = vmatprep.mubr.f32.mxu1 %v297_v47  ;;  %2223 = vmatpush3.bf16.msra.mxu1 %v2222_v49  ;;  %v471_v30 = vld [vmem:[#allocation4 + $0x2e8] sm:$0xff]  ;;  %v324_v32 = vld [vmem:[%s2896_s6 + $0x128] sm:$0xff]  ;;  %v2211_v34 = vpack.c.bf16 %v453_v28, %v452_v27  ;;  %v454_v37 = vld [vmem:[#allocation4 + $0x260] sm:$0xff] }
  0xa2   : > { %593 = vmatmul.mubr.f32.gmra.mrb[2].mxu0 %v294_v55  ;;  %2248 = vmatprep.subr.bf16.mxu1 %v2698_v48  ;;  %v322_v31 = vld [vmem:[%s2896_s6 + $0x118] sm:$0xff]  ;;  %v332_v35 = vld [vmem:[%s2896_s6 + $0x168] sm:$0xff]  ;;  %v2213_v36 = vpack.c.bf16 %v471_v30, %v470_v29  ;;  %v329_v41 = vld [vmem:[%s2896_s6 + $0x150] sm:$0xff] }
  0xa3   : > { %597 = vmatprep.mubr.f32.mxu0 %v302_v57  ;;  %2196 = vmatpush3.bf16.msra.mxu0 %v2195_v58  ;;  %v330_v33 = vld [vmem:[%s2896_s6 + $0x158] sm:$0xff]  ;;  %v472_v39 = vld [vmem:[#allocation4 + $0x2f0] sm:$0xff]  ;;  %v473_v40 = vld [vmem:[#allocation4 + $0x2f8] sm:$0xff] }
  0xa4   : > { %723 = vmatmul.mubr.f32.gmra.mrb[2].mxu1 %v296_v56  ;;  %2198 = vmatprep.subr.bf16.mxu0 %v2197_v60  ;;  %v455_v38 = vld [vmem:[#allocation4 + $0x268] sm:$0xff]  ;;  %v337_v43 = vld [vmem:[%s2896_s6 + $0x190] sm:$0xff]  ;;  %v2217_v46 = vpack.c.bf16 %v473_v40, %v472_v39  ;;  %v456_v47 = vld [vmem:[#allocation4 + $0x270] sm:$0xff] }
  0xa5   : > { %727 = vmatprep.mubr.f32.mxu1 %v304_v59  ;;  %v331_v42 = vld [vmem:[%s2896_s6 + $0x160] sm:$0xff]  ;;  %v2215_v44 = vpack.c.bf16 %v455_v38, %v454_v37  ;;  %v457_v49 = vld [vmem:[#allocation4 + $0x278] sm:$0xff]  ;;  %v338_v51 = vld [vmem:[%s2896_s6 + $0x198] sm:$0xff] }
  0xa6   : > { %598 = vmatmul.mubr.f32.gmra.mrb[4].mxu0 %v301_v1  ;;  %v339_v45 = vld [vmem:[%s2896_s6 + $0x1a0] sm:$0xff]  ;;  %v336_v50 = vld [vmem:[%s2896_s6 + $0x188] sm:$0xff]  ;;  %v2219_v53 = vpack.c.bf16 %v457_v49, %v456_v47  ;;  %v346_v54 = vld [vmem:[%s2896_s6 + $0x1d8] sm:$0xff] }
  0xa7   : > { %602 = vmatprep.mubr.f32.mxu0 %v309_v3  ;;  %2200 = vmatpush3.bf16.msra.mxu0 %v2199_v4  ;;  %v344_v52 = vld [vmem:[%s2896_s6 + $0x1c8] sm:$0xff]  ;;  %v343_v55 = vld [vmem:[%s2896_s6 + $0x1c0] sm:$0xff]  ;;  %v345_v56 = vld [vmem:[%s2896_s6 + $0x1d0] sm:$0xff] }
  0xa8   : > { %728 = vmatmul.mubr.f32.gmra.mrb[4].mxu1 %v303_v2  ;;  %2202 = vmatprep.subr.bf16.mxu0 %v2201_v6  ;;  %v351_v57 = vld [vmem:[%s2896_s6 + $0x200] sm:$0xff]  ;;  %v353_v58 = vld [vmem:[%s2896_s6 + $0x210] sm:$0xff]  ;;  %v350_v59 = vld [vmem:[%s2896_s6 + $0x1f8] sm:$0xff] }
  0xa9   : > { %732 = vmatprep.mubr.f32.mxu1 %v311_v5  ;;  %v352_v60 = vld [vmem:[%s2896_s6 + $0x208] sm:$0xff]  ;;  %v358_v61 = vld [vmem:[%s2896_s6 + $0x238] sm:$0xff]  ;;  %v357_v63 = vld [vmem:[%s2896_s6 + $0x230] sm:$0xff] }
  0xaa   : > { %603 = vmatmul.mubr.f32.gmra.mrb[6].mxu0 %v308_v11  ;;  %v360_v62 = vld [vmem:[%s2896_s6 + $0x248] sm:$0xff]  ;;  %v359_v0 = vld [vmem:[%s2896_s6 + $0x240] sm:$0xff]  ;;  %v365_v1 = vld [vmem:[%s2896_s6 + $0x270] sm:$0xff] }
  0xab   : > { %607 = vmatprep.mubr.f32.mxu0 %v316_v13  ;;  %2204 = vmatpush3.bf16.msra.mxu0 %v2203_v14  ;;  %v367_v2 = vld [vmem:[%s2896_s6 + $0x280] sm:$0xff]  ;;  %v364_v3 = vld [vmem:[%s2896_s6 + $0x268] sm:$0xff]  ;;  %v366_v4 = vld [vmem:[%s2896_s6 + $0x278] sm:$0xff] }
  0xac   : > { %733 = vmatmul.mubr.f32.gmra.mrb[6].mxu1 %v310_v12  ;;  %2206 = vmatprep.subr.bf16.mxu0 %v2205_v16  ;;  %v372_v5 = vld [vmem:[%s2896_s6 + $0x2a8] sm:$0xff]  ;;  %v374_v6 = vld [vmem:[%s2896_s6 + $0x2b8] sm:$0xff]  ;;  %v371_v7 = vld [vmem:[%s2896_s6 + $0x2a0] sm:$0xff]  ;;  %v2700_v12 = vmov 0.0  }
  0xad   : > { %737 = vmatprep.mubr.f32.mxu1 %v318_v15  ;;  %v373_v8 = vld [vmem:[%s2896_s6 + $0x2b0] sm:$0xff]  ;;  %v292_v9 = vld [vmem:[%s2896_s6 + $0x28] sm:$0xff]  ;;  %v291_v10 = vld [vmem:[%s2896_s6 + $0x20] sm:$0xff] }
  0xae   : > { %608 = vmatmul.mubr.f32.gmra.mrb[8].mxu0 %v315_v21  ;;  %v299_v11 = vld [vmem:[%s2896_s6 + $0x60] sm:$0xff]  ;;  %v293_v13 = vld [vmem:[%s2896_s6 + $0x30] sm:$0xff]  ;;  %v298_v14 = vld [vmem:[%s2896_s6 + $0x58] sm:$0xff] }
  0xaf   : > { %612 = vmatprep.mubr.f32.mxu0 %v323_v23  ;;  %2208 = vmatpush3.bf16.msra.mxu0 %v2207_v24  ;;  %v306_v15 = vld [vmem:[%s2896_s6 + $0x98] sm:$0xff]  ;;  %v300_v16 = vld [vmem:[%s2896_s6 + $0x68] sm:$0xff]  ;;  %v305_v17 = vld [vmem:[%s2896_s6 + $0x90] sm:$0xff] }
  0xb0   : > { %738 = vmatmul.mubr.f32.gmra.mrb[8].mxu1 %v317_v22  ;;  %2210 = vmatprep.subr.bf16.mxu0 %v2209_v26  ;;  %v313_v18 = vld [vmem:[%s2896_s6 + $0xd0] sm:$0xff]  ;;  %v307_v19 = vld [vmem:[%s2896_s6 + $0xa0] sm:$0xff]  ;;  %v312_v20 = vld [vmem:[%s2896_s6 + $0xc8] sm:$0xff] }
  0xb1   : > { %742 = vmatprep.mubr.f32.mxu1 %v325_v25  ;;  %v320_v21 = vld [vmem:[%s2896_s6 + $0x108] sm:$0xff]  ;;  %v314_v22 = vld [vmem:[%s2896_s6 + $0xd8] sm:$0xff]  ;;  %v319_v23 = vld [vmem:[%s2896_s6 + $0x100] sm:$0xff] }
  0xb2   : > { %613 = vmatmul.mubr.f32.gmra.mrb[10].mxu0 %v322_v31  ;;  %v327_v24 = vld [vmem:[%s2896_s6 + $0x140] sm:$0xff]  ;;  %v321_v25 = vld [vmem:[%s2896_s6 + $0x110] sm:$0xff]  ;;  %v326_v26 = vld [vmem:[%s2896_s6 + $0x138] sm:$0xff] }
  0xb3   : > { %617 = vmatprep.mubr.f32.mxu0 %v330_v33  ;;  %2212 = vmatpush3.bf16.msra.mxu0 %v2211_v34  ;;  %v334_v27 = vld [vmem:[%s2896_s6 + $0x178] sm:$0xff]  ;;  %v328_v28 = vld [vmem:[%s2896_s6 + $0x148] sm:$0xff]  ;;  %v333_v29 = vld [vmem:[%s2896_s6 + $0x170] sm:$0xff] }
  0xb4   : > { %743 = vmatmul.mubr.f32.gmra.mrb[10].mxu1 %v324_v32  ;;  %2214 = vmatprep.subr.bf16.mxu0 %v2213_v36  ;;  %v341_v30 = vld [vmem:[%s2896_s6 + $0x1b0] sm:$0xff]  ;;  %v335_v31 = vld [vmem:[%s2896_s6 + $0x180] sm:$0xff]  ;;  %v340_v32 = vld [vmem:[%s2896_s6 + $0x1a8] sm:$0xff] }
  0xb5   : > { %747 = vmatprep.mubr.f32.mxu1 %v332_v35  ;;  %v348_v33 = vld [vmem:[%s2896_s6 + $0x1e8] sm:$0xff]  ;;  %v342_v34 = vld [vmem:[%s2896_s6 + $0x1b8] sm:$0xff]  ;;  %v347_v35 = vld [vmem:[%s2896_s6 + $0x1e0] sm:$0xff] }
  0xb6   : > { %618 = vmatmul.mubr.f32.gmra.mrb[12].mxu0 %v329_v41  ;;  %v355_v36 = vld [vmem:[%s2896_s6 + $0x220] sm:$0xff]  ;;  %v349_v37 = vld [vmem:[%s2896_s6 + $0x1f0] sm:$0xff]  ;;  %v354_v38 = vld [vmem:[%s2896_s6 + $0x218] sm:$0xff] }
  0xb7   : > { %622 = vmatprep.mubr.f32.mxu0 %v337_v43  ;;  %2216 = vmatpush3.bf16.msra.mxu0 %v2215_v44  ;;  %v362_v39 = vld [vmem:[%s2896_s6 + $0x258] sm:$0xff]  ;;  %v356_v40 = vld [vmem:[%s2896_s6 + $0x228] sm:$0xff]  ;;  %v361_v41 = vld [vmem:[%s2896_s6 + $0x250] sm:$0xff] }
  0xb8   : > { %748 = vmatmul.mubr.f32.gmra.mrb[12].mxu1 %v331_v42  ;;  %2218 = vmatprep.subr.bf16.mxu0 %v2217_v46  ;;  %v369_v42 = vld [vmem:[%s2896_s6 + $0x290] sm:$0xff]  ;;  %v363_v43 = vld [vmem:[%s2896_s6 + $0x260] sm:$0xff]  ;;  %v368_v44 = vld [vmem:[%s2896_s6 + $0x288] sm:$0xff] }
  0xb9   : > { %752 = vmatprep.mubr.f32.mxu1 %v339_v45  ;;  %v376_v45 = vld [vmem:[%s2896_s6 + $0x2c8] sm:$0xff]  ;;  %v370_v46 = vld [vmem:[%s2896_s6 + $0x298] sm:$0xff]  ;;  %v375_v47 = vld [vmem:[%s2896_s6 + $0x2c0] sm:$0xff] }
  0xba   : > { %623 = vmatmul.mubr.f32.gmra.mrb[14].mxu0 %v336_v50  ;;  %v377_v49 = vld [vmem:[%s2896_s6 + $0x2d0] sm:$0xff]  ;;  %v1121_v50 = vld [vmem:[#allocation6] sm:$0xff] }
  0xbb   : > { %627 = vmatprep.mubr.f32.mxu0 %v344_v52  ;;  %2220 = vmatpush3.bf16.msra.mxu0 %v2219_v53  ;;  %v1123_v53 = vld [vmem:[#allocation6 + $0x10] sm:$0xff] }
  0xbc   : > { %753 = vmatmul.mubr.f32.gmra.mrb[14].mxu1 %v338_v51  ;;  %2224 = vmatprep.subr.bf16.mxu0 %v2698_v48  ;;  %v1122_v51 = vld [vmem:[#allocation6 + $0x8] sm:$0xff] }
  0xbd   : > { %757 = vmatprep.mubr.f32.mxu1 %v346_v54  ;;  %v2225_v52 = vpack.c.bf16 %v1122_v51, %v1121_v50  ;;  %v1124_v54 = vld [vmem:[#allocation6 + $0x18] sm:$0xff] }
  0xbe   : > { %628 = vmatmul.mubr.f32.gmra.mrb[16].mxu0 %v343_v55  ;;  %v2228_v55 = vpack.c.bf16 %v1124_v54, %v1123_v53 }
  0xbf   : > { %632 = vmatprep.mubr.f32.mxu0 %v351_v57  ;;  %v1126_v57 = vld [vmem:[#allocation6 + $0x28] sm:$0xff] }
  0xc0   : > { %758 = vmatmul.mubr.f32.gmra.mrb[16].mxu1 %v345_v56  ;;  %v1125_v56 = vld [vmem:[#allocation6 + $0x20] sm:$0xff] }
  0xc1   : > { %762 = vmatprep.mubr.f32.mxu1 %v353_v58  ;;  %v2231_v58 = vpack.c.bf16 %v1126_v57, %v1125_v56 }
  0xc2   : > { %633 = vmatmul.mubr.f32.gmra.mrb[18].mxu0 %v350_v59  ;;  %v1127_v59 = vld [vmem:[#allocation6 + $0x30] sm:$0xff] }
  0xc3   : > { %637 = vmatprep.mubr.f32.mxu0 %v358_v61 }
  0xc4   : > { %763 = vmatmul.mubr.f32.gmra.mrb[18].mxu1 %v352_v60  ;;  %v1128_v60 = vld [vmem:[#allocation6 + $0x38] sm:$0xff] }
  0xc5   : > { %767 = vmatprep.mubr.f32.mxu1 %v360_v62  ;;  %v2234_v61 = vpack.c.bf16 %v1128_v60, %v1127_v59  ;;  %v1129_v62 = vld [vmem:[#allocation6 + $0x40] sm:$0xff] }
  0xc6   : > { %638 = vmatmul.mubr.f32.gmra.mrb[20].mxu0 %v357_v63  ;;  %v1130_v63 = vld [vmem:[#allocation6 + $0x48] sm:$0xff] }
  0xc7   : > { %642 = vmatprep.mubr.f32.mxu0 %v365_v1  ;;  %v1131_v1 = vld [vmem:[#allocation6 + $0x50] sm:$0xff] }
  0xc8   : > { %768 = vmatmul.mubr.f32.gmra.mrb[20].mxu1 %v359_v0  ;;  %v2237_v0 = vpack.c.bf16 %v1130_v63, %v1129_v62 }
  0xc9   : > { %772 = vmatprep.mubr.f32.mxu1 %v367_v2  ;;  %v1132_v2 = vld [vmem:[#allocation6 + $0x58] sm:$0xff] }
  0xca   : > { %643 = vmatmul.mubr.f32.gmra.mrb[22].mxu0 %v364_v3  ;;  %v2240_v3 = vpack.c.bf16 %v1132_v2, %v1131_v1 }
  0xcb   : > { %647 = vmatprep.mubr.f32.mxu0 %v372_v5  ;;  %v1134_v5 = vld [vmem:[#allocation6 + $0x68] sm:$0xff] }
  0xcc   : > { %773 = vmatmul.mubr.f32.gmra.mrb[22].mxu1 %v366_v4  ;;  %v1133_v4 = vld [vmem:[#allocation6 + $0x60] sm:$0xff] }
  0xcd   : > { %777 = vmatprep.mubr.f32.mxu1 %v374_v6  ;;  %v2243_v6 = vpack.c.bf16 %v1134_v5, %v1133_v4 }
  0xce   : > { %648 = vmatmul.mubr.f32.gmra.mrb[24].mxu0 %v371_v7  ;;  %v1135_v7 = vld [vmem:[#allocation6 + $0x70] sm:$0xff] }
  0xcf   : > { %847 = vmatprep.mubr.f32.mxu0 %v292_v9 }
  0xd0   : > { %778 = vmatmul.mubr.f32.gmra.mrb[24].mxu1 %v373_v8  ;;  %v1136_v8 = vld [vmem:[#allocation6 + $0x78] sm:$0xff] }
  0xd1   : > { %2015 = vmatprep.mubr.msk.f32.mxu1 %vm2699_vm0, %v2700_v12  ;;  %v2246_v9 = vpack.c.bf16 %v1136_v8, %v1135_v7 }
  0xd2   : > { %848 = vmatmul.mubr.f32.vlgmr.msra.gmra.mrb[26].mxu0 %v291_v10 }
  0xd3   : > { %852 = vmatprep.mubr.f32.mxu0 %v299_v11  ;;  %2226 = vmatpush3.bf16.msra.mxu0 %v2225_v52  ;;  %v3060_v11 = vld [vmem:[%s3330_s2] ss:$0 sm:$0xff] }
  0xd4   : > { %2016 = vmatmul.mubr.msk.f32.vlgmr.msra.gmra.mrb[26].mxu1 %vm483_vm1, %v293_v13  ;;  %2227 = vmatprep.subr.bf16.mxu0 %v2698_v48 }
  0xd5   : > { %2018 = vmatprep.mubr.msk.f32.mxu1 %vm2699_vm0, %v2700_v12  ;;  %2256 = vmatpush3.bf16.msra.mxu1 %v2225_v52 }
  0xd6   : > { %853 = vmatmul.mubr.f32.gmra.mrb[28].mxu0 %v298_v14  ;;  %2249 = vmatprep.subr.bf16.mxu1 %v2698_v48 }
  0xd7   : > { %857 = vmatprep.mubr.f32.mxu0 %v306_v15  ;;  %2229 = vmatpush3.bf16.msra.mxu0 %v2228_v55 }
  0xd8   : > { %2019 = vmatmul.mubr.msk.f32.gmra.mrb[28].mxu1 %vm483_vm1, %v300_v16  ;;  %2230 = vmatprep.subr.bf16.mxu0 %v2698_v48 }
  0xd9   : > { %2021 = vmatprep.mubr.msk.f32.mxu1 %vm2699_vm0, %v2700_v12  ;;  %2257 = vmatpush3.bf16.msra.mxu1 %v2228_v55 }
  0xda   : > { %858 = vmatmul.mubr.f32.gmra.mrb[30].mxu0 %v305_v17  ;;  %2250 = vmatprep.subr.bf16.mxu1 %v2698_v48 }
  0xdb   : > { %862 = vmatprep.mubr.f32.mxu0 %v313_v18  ;;  %2232 = vmatpush3.bf16.msra.mxu0 %v2231_v58 }
  0xdc   : > { %2022 = vmatmul.mubr.msk.f32.gmra.mrb[30].mxu1 %vm483_vm1, %v307_v19  ;;  %2233 = vmatprep.subr.bf16.mxu0 %v2698_v48 }
  0xdd   : > { %2024 = vmatprep.mubr.msk.f32.mxu1 %vm2699_vm0, %v2700_v12  ;;  %2258 = vmatpush3.bf16.msra.mxu1 %v2231_v58 }
  0xde   : > { %863 = vmatmul.mubr.f32.gmra.mrb[32].mxu0 %v312_v20  ;;  %2251 = vmatprep.subr.bf16.mxu1 %v2698_v48 }
  0xdf   : > { %867 = vmatprep.mubr.f32.mxu0 %v320_v21  ;;  %2235 = vmatpush3.bf16.msra.mxu0 %v2234_v61 }
  0xe0   : > { %2025 = vmatmul.mubr.msk.f32.gmra.mrb[32].mxu1 %vm483_vm1, %v314_v22  ;;  %2236 = vmatprep.subr.bf16.mxu0 %v2698_v48 }
  0xe1   : > { %2027 = vmatprep.mubr.msk.f32.mxu1 %vm2699_vm0, %v2700_v12  ;;  %2259 = vmatpush3.bf16.msra.mxu1 %v2234_v61 }
  0xe2   : > { %868 = vmatmul.mubr.f32.gmra.mrb[34].mxu0 %v319_v23  ;;  %2252 = vmatprep.subr.bf16.mxu1 %v2698_v48 }
  0xe3   : > { %872 = vmatprep.mubr.f32.mxu0 %v327_v24  ;;  %2238 = vmatpush3.bf16.msra.mxu0 %v2237_v0 }
  0xe4   : > { %2028 = vmatmul.mubr.msk.f32.gmra.mrb[34].mxu1 %vm483_vm1, %v321_v25  ;;  %2239 = vmatprep.subr.bf16.mxu0 %v2698_v48 }
  0xe5   : > { %2030 = vmatprep.mubr.msk.f32.mxu1 %vm2699_vm0, %v2700_v12  ;;  %2260 = vmatpush3.bf16.msra.mxu1 %v2237_v0 }
  0xe6   : > { %873 = vmatmul.mubr.f32.gmra.mrb[36].mxu0 %v326_v26  ;;  %2253 = vmatprep.subr.bf16.mxu1 %v2698_v48 }
  0xe7   : > { %877 = vmatprep.mubr.f32.mxu0 %v334_v27  ;;  %2241 = vmatpush3.bf16.msra.mxu0 %v2240_v3 }
  0xe8   : > { %2031 = vmatmul.mubr.msk.f32.gmra.mrb[36].mxu1 %vm483_vm1, %v328_v28  ;;  %2242 = vmatprep.subr.bf16.mxu0 %v2698_v48 }
  0xe9   : > { %2033 = vmatprep.mubr.msk.f32.mxu1 %vm2699_vm0, %v2700_v12  ;;  %2261 = vmatpush3.bf16.msra.mxu1 %v2240_v3 }
  0xea   : > { %878 = vmatmul.mubr.f32.gmra.mrb[38].mxu0 %v333_v29  ;;  %2254 = vmatprep.subr.bf16.mxu1 %v2698_v48 }
  0xeb   : > { %882 = vmatprep.mubr.f32.mxu0 %v341_v30  ;;  %2244 = vmatpush3.bf16.msra.mxu0 %v2243_v6 }
  0xec   : > { %2034 = vmatmul.mubr.msk.f32.gmra.mrb[38].mxu1 %vm483_vm1, %v335_v31  ;;  %2245 = vmatprep.subr.bf16.mxu0 %v2698_v48 }
  0xed   : > { %2036 = vmatprep.mubr.msk.f32.mxu1 %vm2699_vm0, %v2700_v12  ;;  %2262 = vmatpush3.bf16.msra.mxu1 %v2243_v6 }
  0xee   : > { %883 = vmatmul.mubr.f32.gmra.mrb[40].mxu0 %v340_v32  ;;  %2255 = vmatprep.subr.bf16.mxu1 %v2698_v48 }
  0xef   : > { %887 = vmatprep.mubr.f32.mxu0 %v348_v33  ;;  %2247 = vmatpush3.bf16.msra.mxu0 %v2246_v9 }
  0xf0   : > { %2037 = vmatmul.mubr.msk.f32.gmra.mrb[40].mxu1 %vm483_vm1, %v342_v34 }
  0xf1   : > { %2039 = vmatprep.mubr.msk.f32.mxu1 %vm2699_vm0, %v2700_v12  ;;  %2263 = vmatpush3.bf16.msra.mxu1 %v2246_v9 }
  0xf2   : > { %888 = vmatmul.mubr.f32.gmra.mrb[42].mxu0 %v347_v35 }
  0xf3   : > { %892 = vmatprep.mubr.f32.mxu0 %v355_v36 }
  0xf4   : > { %2040 = vmatmul.mubr.msk.f32.gmra.mrb[42].mxu1 %vm483_vm1, %v349_v37 }
  0xf5   : > { %2042 = vmatprep.mubr.msk.f32.mxu1 %vm2699_vm0, %v2700_v12 }
  0xf6   : > { %893 = vmatmul.mubr.f32.gmra.mrb[44].mxu0 %v354_v38 }
  0xf7   : > { %897 = vmatprep.mubr.f32.mxu0 %v362_v39 }
  0xf8   : > { %2043 = vmatmul.mubr.msk.f32.gmra.mrb[44].mxu1 %vm483_vm1, %v356_v40 }
  0xf9   : > { %2045 = vmatprep.mubr.msk.f32.mxu1 %vm2699_vm0, %v2700_v12 }
  0xfa   : > { %898 = vmatmul.mubr.f32.gmra.mrb[46].mxu0 %v361_v41 }
  0xfb   : > { %902 = vmatprep.mubr.f32.mxu0 %v369_v42 }
  0xfc   : > { %2046 = vmatmul.mubr.msk.f32.gmra.mrb[46].mxu1 %vm483_vm1, %v363_v43 }
  0xfd   : > { %2048 = vmatprep.mubr.msk.f32.mxu1 %vm2699_vm0, %v2700_v12 }
  0xfe   : > { %903 = vmatmul.mubr.f32.gmra.mrb[48].mxu0 %v368_v44 }
  0xff   : > { %907 = vmatprep.mubr.f32.mxu0 %v376_v45 }
 0x100   : > { %2049 = vmatmul.mubr.msk.f32.gmra.mrb[48].mxu1 %vm483_vm1, %v370_v46 }
 0x101   : > { %2051 = vmatprep.mubr.msk.f32.mxu1 %vm2699_vm0, %v2700_v12 }
 0x102   : > { %908 = vmatmul.mubr.f32.gmra.mrb[50].mxu0 %v375_v47 }
 0x103   : > { %2086 = vmatprep.mubr.msk.f32.mxu0 %vm2699_vm0, %v2700_v12 }
 0x104   : > { %2052 = vmatmul.mubr.msk.f32.gmra.mrb[50].mxu1 %vm483_vm1, %v377_v49 }
 0x105   : > { %2107 = vmatprep.mubr.msk.f32.mxu1 %vm2699_vm0, %v2700_v12 }
 0x171   : > { %v1786_v10 = vpop.f32.mrb[0].mxu0 }
 0x172   : > { %v1787_v13 = vpop.f32.mrb[1].mxu0 }
 0x173   : > { %v1857_v14 = vpop.f32.mrb[0].mxu1  ;;  %v1788_v15 = vadd.f32 %v1787_v13, %v1786_v10 }
 0x174   : > { %v1858_v16 = vpop.f32.mrb[1].mxu1 }
 0x175   : > { %v1859_v17 = vadd.f32 %v1858_v16, %v1857_v14  ;;  %v590_v18 = vadd.f32 %v1788_v15, %v3060_v11  ;;  %v1789_v19 = vpop.f32.mrb[2].mxu0 }
 0x176   : > { %v1790_v20 = vpop.f32.mrb[3].mxu0 }
 0x177   : > { %v1860_v21 = vpop.f32.mrb[2].mxu1  ;;  %v3063_v48 = vadd.f32 %v1859_v17, %v590_v18  ;;  %v1791_v22 = vadd.f32 %v1790_v20, %v1789_v19 }
 0x178   : > { %v1861_v23 = vpop.f32.mrb[3].mxu1 }
 0x179   : > { %v1862_v24 = vadd.f32 %v1861_v23, %v1860_v21  ;;  %v595_v25 = vadd.f32 %v1791_v22, %v3060_v11  ;;  %v1792_v26 = vpop.f32.mrb[4].mxu0 }
 0x17a   : > { %v1793_v27 = vpop.f32.mrb[5].mxu0 }
 0x17b   : > { %v1863_v28 = vpop.f32.mrb[4].mxu1  ;;  %v3066_v29 = vadd.f32 %v1862_v24, %v595_v25  ;;  %v1794_v30 = vadd.f32 %v1793_v27, %v1792_v26 }
 0x17c   : > { %v1864_v31 = vpop.f32.mrb[5].mxu1 }
 0x17d   : > { %v1865_v32 = vadd.f32 %v1864_v31, %v1863_v28  ;;  %v600_v33 = vadd.f32 %v1794_v30, %v3060_v11  ;;  %v1795_v34 = vpop.f32.mrb[6].mxu0 }
 0x17e   : > { %v1796_v35 = vpop.f32.mrb[7].mxu0 }
 0x17f   : > { %v1866_v36 = vpop.f32.mrb[6].mxu1  ;;  %v3069_v37 = vadd.f32 %v1865_v32, %v600_v33  ;;  %v1797_v38 = vadd.f32 %v1796_v35, %v1795_v34 }
 0x180   : > { %v1867_v39 = vpop.f32.mrb[7].mxu1 }
 0x181   : > { %v1868_v40 = vadd.f32 %v1867_v39, %v1866_v36  ;;  %v605_v41 = vadd.f32 %v1797_v38, %v3060_v11  ;;  %v1798_v42 = vpop.f32.mrb[8].mxu0 }
 0x182   : > { %v1799_v43 = vpop.f32.mrb[9].mxu0 }
 0x183   : > { %v1869_v44 = vpop.f32.mrb[8].mxu1  ;;  %v3072_v45 = vadd.f32 %v1868_v40, %v605_v41  ;;  %v1800_v46 = vadd.f32 %v1799_v43, %v1798_v42 }
 0x184   : > { %v1870_v47 = vpop.f32.mrb[9].mxu1 }
 0x185   : > { %v1871_v49 = vadd.f32 %v1870_v47, %v1869_v44  ;;  %v610_v50 = vadd.f32 %v1800_v46, %v3060_v11  ;;  %v1801_v51 = vpop.f32.mrb[10].mxu0 }
 0x186   : > { %v1802_v52 = vpop.f32.mrb[11].mxu0 }
 0x187   : > { %v1872_v53 = vpop.f32.mrb[10].mxu1  ;;  %v3075_v54 = vadd.f32 %v1871_v49, %v610_v50  ;;  %v1803_v55 = vadd.f32 %v1802_v52, %v1801_v51 }
 0x188   : > { %v1873_v56 = vpop.f32.mrb[11].mxu1 }
 0x189   : > { %v1874_v57 = vadd.f32 %v1873_v56, %v1872_v53  ;;  %v615_v58 = vadd.f32 %v1803_v55, %v3060_v11  ;;  %v1804_v59 = vpop.f32.mrb[12].mxu0 }
 0x18a   : > { %v1805_v60 = vpop.f32.mrb[13].mxu0 }
 0x18b   : > { %v1875_v61 = vpop.f32.mrb[12].mxu1  ;;  %v3078_v62 = vadd.f32 %v1874_v57, %v615_v58  ;;  %v1806_v63 = vadd.f32 %v1805_v60, %v1804_v59 }
 0x18c   : > { %v1876_v0 = vpop.f32.mrb[13].mxu1 }
 0x18d   : > { %v1877_v1 = vadd.f32 %v1876_v0, %v1875_v61  ;;  %v620_v2 = vadd.f32 %v1806_v63, %v3060_v11  ;;  %v1807_v3 = vpop.f32.mrb[14].mxu0 }
 0x18e   : > { %v1808_v4 = vpop.f32.mrb[15].mxu0 }
 0x18f   : > { %v1878_v5 = vpop.f32.mrb[14].mxu1  ;;  %v3081_v6 = vadd.f32 %v1877_v1, %v620_v2  ;;  %v1809_v7 = vadd.f32 %v1808_v4, %v1807_v3 }
 0x190   : > { %v1879_v8 = vpop.f32.mrb[15].mxu1 }
 0x191   : > { %v1880_v9 = vadd.f32 %v1879_v8, %v1878_v5  ;;  %v625_v10 = vadd.f32 %v1809_v7, %v3060_v11  ;;  %v1810_v13 = vpop.f32.mrb[16].mxu0 }
 0x192   : > { %v1811_v14 = vpop.f32.mrb[17].mxu0 }
 0x193   : > { %v1881_v15 = vpop.f32.mrb[16].mxu1  ;;  %v3084_v16 = vadd.f32 %v1880_v9, %v625_v10  ;;  %v1812_v17 = vadd.f32 %v1811_v14, %v1810_v13 }
 0x194   : > { %v1882_v18 = vpop.f32.mrb[17].mxu1 }
 0x195   : > { %v1883_v19 = vadd.f32 %v1882_v18, %v1881_v15  ;;  %v630_v20 = vadd.f32 %v1812_v17, %v3060_v11  ;;  %v1813_v21 = vpop.f32.mrb[18].mxu0 }
 0x196   : > { %v1814_v22 = vpop.f32.mrb[19].mxu0 }
 0x197   : > { %v1884_v23 = vpop.f32.mrb[18].mxu1  ;;  %v3087_v24 = vadd.f32 %v1883_v19, %v630_v20  ;;  %v1815_v25 = vadd.f32 %v1814_v22, %v1813_v21 }
 0x198   : > { %v1885_v26 = vpop.f32.mrb[19].mxu1 }
 0x199   : > { %v1886_v27 = vadd.f32 %v1885_v26, %v1884_v23  ;;  %v635_v28 = vadd.f32 %v1815_v25, %v3060_v11  ;;  %v1816_v30 = vpop.f32.mrb[20].mxu0 }
 0x19a   : > { %v1817_v31 = vpop.f32.mrb[21].mxu0 }
 0x19b   : > { %v1887_v32 = vpop.f32.mrb[20].mxu1  ;;  %v3090_v33 = vadd.f32 %v1886_v27, %v635_v28  ;;  %v1818_v34 = vadd.f32 %v1817_v31, %v1816_v30 }
 0x19c   : > { %v1888_v35 = vpop.f32.mrb[21].mxu1 }
 0x19d   : > { %v1889_v36 = vadd.f32 %v1888_v35, %v1887_v32  ;;  %v640_v38 = vadd.f32 %v1818_v34, %v3060_v11  ;;  %v1819_v39 = vpop.f32.mrb[22].mxu0 }
 0x19e   : > { %v1820_v40 = vpop.f32.mrb[23].mxu0 }
 0x19f   : > { %v1890_v41 = vpop.f32.mrb[22].mxu1  ;;  %v3093_v42 = vadd.f32 %v1889_v36, %v640_v38  ;;  %v1821_v43 = vadd.f32 %v1820_v40, %v1819_v39 }
 0x1a0   : > { %v1891_v44 = vpop.f32.mrb[23].mxu1 }
 0x1a1   : > { %v1892_v46 = vadd.f32 %v1891_v44, %v1890_v41  ;;  %v645_v47 = vadd.f32 %v1821_v43, %v3060_v11  ;;  %v1822_v49 = vpop.f32.mrb[24].mxu0 }
 0x1a2   : > { %v1823_v50 = vpop.f32.mrb[25].mxu0 }
 0x1a3   : > { %v1893_v51 = vpop.f32.mrb[24].mxu1  ;;  %v3096_v52 = vadd.f32 %v1892_v46, %v645_v47  ;;  %v1824_v53 = vadd.f32 %v1823_v50, %v1822_v49 }
 0x1a4   : > { %v1894_v55 = vpop.f32.mrb[25].mxu1 }
 0x1a5   : > { %v1895_v56 = vadd.f32 %v1894_v55, %v1893_v51  ;;  %v650_v57 = vadd.f32 %v1824_v53, %v3060_v11  ;;  %v1928_v58 = vpop.f32.mrb[26].mxu0 }
 0x1a6   : > { %v1929_v59 = vpop.f32.mrb[27].mxu0 }
 0x1a7   : > { %v979_v60 = vpop.f32.mrb[26].mxu1  ;;  %v3099_v61 = vadd.f32 %v1895_v56, %v650_v57  ;;  %v1930_v63 = vadd.f32 %v1929_v59, %v1928_v58 }
 0x1a8   : > { %v2017_v0 = vpop.f32.mrb[27].mxu1 }
 0x1a9   : > { %v1931_v1 = vpop.f32.mrb[28].mxu0  ;;  %v850_v2 = vadd.f32 %v1930_v63, %v3063_v48 }
 0x1aa   : > { %v1932_v3 = vpop.f32.mrb[29].mxu0 }
 0x1ab   : > { %v984_v4 = vpop.f32.mrb[28].mxu1  ;;  %v1933_v5 = vadd.f32 %v1932_v3, %v1931_v1  ;;  %v980_v7 = vadd.f32 %v979_v60, %v850_v2 }
 0x1ac   : > { %v2020_v8 = vpop.f32.mrb[29].mxu1 }
 0x1ad   : > { %v1043_v9 = vsub.f32 0.0, %v980_v7  ;;  %v1934_v10 = vpop.f32.mrb[30].mxu0  ;;  %v855_v13 = vadd.f32 %v1933_v5, %v3066_v29 }
 0x1ae   : > { %v1935_v11 = vpop.f32.mrb[31].mxu0 }
 0x1af   : > { %v989_v14 = vpop.f32.mrb[30].mxu1  ;;  %v1056_v15 = vmul.f32 1.442695, %v1043_v9  ;;  %v1936_v17 = vadd.f32 %v1935_v11, %v1934_v10  ;;  %v985_v18 = vadd.f32 %v984_v4, %v855_v13 }
 0x1b0   : > { %v2023_v19 = vpop.f32.mrb[31].mxu1 }
 0x1b1   : > { %2395 = vpow2.f32 %v1056_v15  ;;  %v1044_v20 = vsub.f32 0.0, %v985_v18  ;;  %v1937_v21 = vpop.f32.mrb[32].mxu0  ;;  %v860_v48 = vadd.f32 %v1936_v17, %v3069_v37 }
 0x1b2   : > { %v1938_v22 = vpop.f32.mrb[33].mxu0 }
 0x1b3   : > { %v994_v23 = vpop.f32.mrb[32].mxu1  ;;  %v1058_v25 = vmul.f32 1.442695, %v1044_v20  ;;  %v1939_v26 = vadd.f32 %v1938_v22, %v1937_v21  ;;  %v990_v27 = vadd.f32 %v989_v14, %v860_v48 }
 0x1b4   : > { %v2026_v28 = vpop.f32.mrb[33].mxu1 }
 0x1b5   : > { %2397 = vpow2.f32 %v1058_v25  ;;  %v1045_v30 = vsub.f32 0.0, %v990_v27  ;;  %v1940_v29 = vpop.f32.mrb[34].mxu0  ;;  %v865_v31 = vadd.f32 %v1939_v26, %v3072_v45 }
 0x1b6   : > { %v1941_v32 = vpop.f32.mrb[35].mxu0 }
 0x1b7   : > { %v999_v34 = vpop.f32.mrb[34].mxu1  ;;  %v1060_v35 = vmul.f32 1.442695, %v1045_v30  ;;  %v1942_v36 = vadd.f32 %v1941_v32, %v1940_v29  ;;  %v995_v38 = vadd.f32 %v994_v23, %v865_v31 }
 0x1b8   : > { %v2029_v39 = vpop.f32.mrb[35].mxu1 }
 0x1b9   : > { %2399 = vpow2.f32 %v1060_v35  ;;  %v1046_v40 = vsub.f32 0.0, %v995_v38  ;;  %v1943_v37 = vpop.f32.mrb[36].mxu0  ;;  %v870_v41 = vadd.f32 %v1942_v36, %v3075_v54 }
 0x1ba   : > { %v1944_v43 = vpop.f32.mrb[37].mxu0 }
 0x1bb   : > { %v1004_v44 = vpop.f32.mrb[36].mxu1  ;;  %v2396_v46 = vpop.eup %2395  ;;  %v1062_v47 = vmul.f32 1.442695, %v1046_v40  ;;  %v1945_v49 = vadd.f32 %v1944_v43, %v1943_v37  ;;  %v1000_v50 = vadd.f32 %v999_v34, %v870_v41 }
 0x1bc   : > { %v2032_v51 = vpop.f32.mrb[37].mxu1  ;;  %v1082_v53 = vadd.f32 1.0, %v2396_v46 }
 0x1bd   : > { %2401 = vpow2.f32 %v1062_v47  ;;  %v1047_v45 = vsub.f32 0.0, %v1000_v50  ;;  %v1946_v55 = vpop.f32.mrb[38].mxu0  ;;  %v875_v56 = vadd.f32 %v1945_v49, %v3078_v62 }
 0x1be   : > { %2403 = vrcp.f32 %v1082_v53  ;;  %v1947_v57 = vpop.f32.mrb[39].mxu0 }
 0x1bf   : > { %v1009_v58 = vpop.f32.mrb[38].mxu1  ;;  %v2398_v59 = vpop.eup %2397  ;;  %v1064_v60 = vmul.f32 1.442695, %v1047_v45  ;;  %v1948_v63 = vadd.f32 %v1947_v57, %v1946_v55  ;;  %v1005_v54 = vadd.f32 %v1004_v44, %v875_v56 }
 0x1c0   : > { %v2035_v0 = vpop.f32.mrb[39].mxu1  ;;  %v1083_v1 = vadd.f32 1.0, %v2398_v59 }
 0x1c1   : > { %2405 = vpow2.f32 %v1064_v60  ;;  %v1048_v2 = vsub.f32 0.0, %v1005_v54  ;;  %v1949_v3 = vpop.f32.mrb[40].mxu0  ;;  %v880_v4 = vadd.f32 %v1948_v63, %v3081_v6 }
 0x1c2   : > { %2407 = vrcp.f32 %v1083_v1  ;;  %v1950_v5 = vpop.f32.mrb[41].mxu0 }
 0x1c3   : > { %v1014_v7 = vpop.f32.mrb[40].mxu1  ;;  %v2400_v8 = vpop.eup %2399  ;;  %v1066_v9 = vmul.f32 1.442695, %v1048_v2  ;;  %v1951_v62 = vadd.f32 %v1950_v5, %v1949_v3  ;;  %v1010_v10 = vadd.f32 %v1009_v58, %v880_v4 }
 0x1c4   : > { %v2038_v13 = vpop.f32.mrb[41].mxu1  ;;  %v1084_v11 = vadd.f32 1.0, %v2400_v8 }
 0x1c5   : > { %2409 = vpow2.f32 %v1066_v9  ;;  %v1049_v14 = vsub.f32 0.0, %v1010_v10  ;;  %v1952_v15 = vpop.f32.mrb[42].mxu0  ;;  %v885_v17 = vadd.f32 %v1951_v62, %v3084_v16 }
 0x1c6   : > { %2411 = vrcp.f32 %v1084_v11  ;;  %v1953_v18 = vpop.f32.mrb[43].mxu0 }
 0x1c7   : > { %v1019_v19 = vpop.f32.mrb[42].mxu1  ;;  %v2402_v20 = vpop.eup %2401  ;;  %v1068_v21 = vmul.f32 1.442695, %v1049_v14  ;;  %v1954_v6 = vadd.f32 %v1953_v18, %v1952_v15  ;;  %v1015_v48 = vadd.f32 %v1014_v7, %v885_v17 }
 0x1c8   : > { %v2041_v22 = vpop.f32.mrb[43].mxu1  ;;  %v2404_v23 = vpop.eup %2403  ;;  %v1085_v25 = vadd.f32 1.0, %v2402_v20 }
 0x1c9   : > { %2413 = vpow2.f32 %v1068_v21  ;;  %v1050_v26 = vsub.f32 0.0, %v1015_v48  ;;  %v1955_v27 = vpop.f32.mrb[44].mxu0  ;;  %2087 = vmatmul.mubr.f32.vlgmr.msra.gmra.mrb[52].mxu0 %v2404_v23  ;;  %v890_v28 = vadd.f32 %v1954_v6, %v3087_v24 }
 0x1ca   : > { %2415 = vrcp.f32 %v1085_v25  ;;  %v1956_v30 = vpop.f32.mrb[45].mxu0  ;;  %2089 = vmatprep.mubr.msk.f32.mxu0 %vm2699_vm0, %v2700_v12 }
 0x1cb   : > { %v1024_v16 = vpop.f32.mrb[44].mxu1  ;;  %v2406_v29 = vpop.eup %2405  ;;  %v1070_v31 = vmul.f32 1.442695, %v1050_v26  ;;  %v1957_v32 = vadd.f32 %v1956_v30, %v1955_v27  ;;  %v1020_v34 = vadd.f32 %v1019_v19, %v890_v28 }
 0x1cc   : > { %v2044_v35 = vpop.f32.mrb[45].mxu1  ;;  %v2408_v36 = vpop.eup %2407  ;;  %v1086_v38 = vadd.f32 1.0, %v2406_v29 }
 0x1cd   : > { %2417 = vpow2.f32 %v1070_v31  ;;  %v1051_v39 = vsub.f32 0.0, %v1020_v34  ;;  %v1958_v40 = vpop.f32.mrb[46].mxu0  ;;  %2090 = vmatmul.mubr.f32.gmra.mrb[54].mxu0 %v2408_v36  ;;  %v895_v37 = vadd.f32 %v1957_v32, %v3090_v33  ;;  %v1740_v35 = vld [vmem:[%s3332_s4] ss:$0 sm:$0xff] }
 0x1ce   : > { %2419 = vrcp.f32 %v1086_v38  ;;  %v1959_v24 = vpop.f32.mrb[47].mxu0  ;;  %2092 = vmatprep.mubr.msk.f32.mxu0 %vm2699_vm0, %v2700_v12 }
 0x1cf   : > { %v1029_v41 = vpop.f32.mrb[46].mxu1  ;;  %v2410_v43 = vpop.eup %2409  ;;  %v1072_v44 = vmul.f32 1.442695, %v1051_v39  ;;  %v1960_v46 = vadd.f32 %v1959_v24, %v1958_v40  ;;  %v1025_v47 = vadd.f32 %v1024_v16, %v895_v37 }
 0x1d0   : > { %v2047_v49 = vpop.f32.mrb[47].mxu1  ;;  %v2412_v50 = vpop.eup %2411  ;;  %v1087_v51 = vadd.f32 1.0, %v2410_v43 }
 0x1d1   : > { %2421 = vpow2.f32 %v1072_v44  ;;  %v1052_v53 = vsub.f32 0.0, %v1025_v47  ;;  %v1961_v45 = vpop.f32.mrb[48].mxu0  ;;  %2093 = vmatmul.mubr.f32.gmra.mrb[56].mxu0 %v2412_v50  ;;  %v900_v55 = vadd.f32 %v1960_v46, %v3093_v42 }
 0x1d2   : > { %2423 = vrcp.f32 %v1087_v51  ;;  %v1962_v33 = vpop.f32.mrb[49].mxu0  ;;  %2095 = vmatprep.mubr.msk.f32.mxu0 %vm2699_vm0, %v2700_v12 }
 0x1d3   : > { %v1034_v56 = vpop.f32.mrb[48].mxu1  ;;  %v2414_v57 = vpop.eup %2413  ;;  %v1074_v58 = vmul.f32 1.442695, %v1052_v53  ;;  %v1963_v59 = vadd.f32 %v1962_v33, %v1961_v45  ;;  %v1030_v60 = vadd.f32 %v1029_v41, %v900_v55 }
 0x1d4   : > { %v2050_v63 = vpop.f32.mrb[49].mxu1  ;;  %v2416_v54 = vpop.eup %2415  ;;  %v1088_v0 = vadd.f32 1.0, %v2414_v57 }
 0x1d5   : > { %2425 = vpow2.f32 %v1074_v58  ;;  %v1053_v1 = vsub.f32 0.0, %v1030_v60  ;;  %v1964_v2 = vpop.f32.mrb[50].mxu0  ;;  %2096 = vmatmul.mubr.f32.gmra.mrb[58].mxu0 %v2416_v54  ;;  %v905_v3 = vadd.f32 %v1963_v59, %v3096_v52 }
 0x1d6   : > { %2427 = vrcp.f32 %v1088_v0  ;;  %v1965_v42 = vpop.f32.mrb[51].mxu0  ;;  %2098 = vmatprep.mubr.msk.f32.mxu0 %vm2699_vm0, %v2700_v12 }
 0x1d7   : > { %v1039_v4 = vpop.f32.mrb[50].mxu1  ;;  %v2418_v5 = vpop.eup %2417  ;;  %v1076_v7 = vmul.f32 1.442695, %v1053_v1  ;;  %v1966_v8 = vadd.f32 %v1965_v42, %v1964_v2  ;;  %v1035_v9 = vadd.f32 %v1034_v56, %v905_v3 }
 0x1d8   : > { %v2053_v62 = vpop.f32.mrb[51].mxu1  ;;  %v2420_v10 = vpop.eup %2419  ;;  %v1089_v13 = vadd.f32 1.0, %v2418_v5 }
 0x1d9   : > { %2429 = vpow2.f32 %v1076_v7  ;;  %v1054_v11 = vsub.f32 0.0, %v1035_v9  ;;  %2099 = vmatmul.mubr.f32.gmra.mrb[60].mxu0 %v2420_v10  ;;  %v910_v14 = vadd.f32 %v1966_v8, %v3099_v61 }
 0x1da   : > { %2431 = vrcp.f32 %v1089_v13  ;;  %2101 = vmatprep.mubr.msk.f32.mxu0 %vm2699_vm0, %v2700_v12 }
 0x1db   : > { %v2422_v52 = vpop.eup %2421  ;;  %v1078_v15 = vmul.f32 1.442695, %v1054_v11  ;;  %v1040_v17 = vadd.f32 %v1039_v4, %v910_v14 }
 0x1dc   : > { %v2424_v18 = vpop.eup %2423  ;;  %v1090_v19 = vadd.f32 1.0, %v2422_v52 }
 0x1dd   : > { %2433 = vpow2.f32 %v1078_v15  ;;  %v1055_v20 = vsub.f32 0.0, %v1040_v17  ;;  %2102 = vmatmul.mubr.f32.gmra.mrb[62].mxu0 %v2424_v18 }
 0x1de   : > { %2435 = vrcp.f32 %v1090_v19  ;;  %2104 = vmatprep.mubr.msk.f32.mxu0 %vm2699_vm0, %v2700_v12 }
 0x1df   : > { %v2426_v21 = vpop.eup %2425  ;;  %v1080_v6 = vmul.f32 1.442695, %v1055_v20 }
 0x1e0   : > { %v2428_v48 = vpop.eup %2427  ;;  %v1091_v61 = vadd.f32 1.0, %v2426_v21 }
 0x1e1   : > { %2437 = vpow2.f32 %v1080_v6  ;;  %2105 = vmatmul.mubr.f32.gmra.mrb[64].mxu0 %v2428_v48 }
 0x1e2   : > { %2439 = vrcp.f32 %v1091_v61 }
 0x1e3   : > { %v2430_v22 = vpop.eup %2429 }
 0x1e4   : > { %v2432_v23 = vpop.eup %2431  ;;  %v1092_v25 = vadd.f32 1.0, %v2430_v22 }
 0x1e5   : > { %2108 = vmatmul.mubr.f32.vlgmr.msra.gmra.mrb[52].mxu1 %v2432_v23 }
 0x1e6   : > { %2441 = vrcp.f32 %v1092_v25  ;;  %2110 = vmatprep.mubr.msk.f32.mxu1 %vm2699_vm0, %v2700_v12 }
 0x1e7   : > { %v2434_v26 = vpop.eup %2433 }
 0x1e8   : > { %v2436_v27 = vpop.eup %2435  ;;  %v1093_v28 = vadd.f32 1.0, %v2434_v26 }
 0x1e9   : > { %2111 = vmatmul.mubr.f32.gmra.mrb[54].mxu1 %v2436_v27 }
 0x1ea   : > { %2443 = vrcp.f32 %v1093_v28  ;;  %2113 = vmatprep.mubr.msk.f32.mxu1 %vm2699_vm0, %v2700_v12 }
 0x1eb   : > { %v2438_v30 = vpop.eup %2437 }
 0x1ec   : > { %v2440_v16 = vpop.eup %2439  ;;  %v1094_v29 = vadd.f32 1.0, %v2438_v30 }
 0x1ed   : > { %2114 = vmatmul.mubr.f32.gmra.mrb[56].mxu1 %v2440_v16 }
 0x1ee   : > { %2445 = vrcp.f32 %v1094_v29  ;;  %2116 = vmatprep.mubr.msk.f32.mxu1 %vm2699_vm0, %v2700_v12 }
 0x1f0   : > { %v2442_v31 = vpop.eup %2441 }
 0x1f1   : > { %2117 = vmatmul.mubr.f32.gmra.mrb[58].mxu1 %v2442_v31 }
 0x1f2   : > { %2119 = vmatprep.mubr.msk.f32.mxu1 %vm2699_vm0, %v2700_v12 }
 0x1f4   : > { %v2444_v32 = vpop.eup %2443 }
 0x1f5   : > { %2120 = vmatmul.mubr.f32.gmra.mrb[60].mxu1 %v2444_v32 }
 0x1f6   : > { %2122 = vmatprep.mubr.msk.f32.mxu1 %vm2699_vm0, %v2700_v12 }
 0x1f8   : > { %v2446_v34 = vpop.eup %2445 }
 0x1f9   : > { %2123 = vmatmul.mubr.f32.gmra.mrb[62].mxu1 %v2446_v34 }
 0x29c   : > { %v1210_v36 = vpop.f32.mrb[52].mxu0 }
 0x29d   : > { %v1211_v38 = vadd.f32 %v1740_v35, %v1210_v36  ;;  %v2088_v39 = vpop.f32.mrb[53].mxu0 }
 0x29f   : > { %1274 = vmax.xlane.f32.xlu0 %v1211_v38 }
 0x2a0   : > { %v1215_v40 = vpop.f32.mrb[54].mxu0 }
 0x2a1   : > { %v1216_v37 = vadd.f32 %v1740_v35, %v1215_v40  ;;  %v2091_v24 = vpop.f32.mrb[55].mxu0 }
 0x2a3   : > { %1276 = vmax.xlane.f32.xlu0 %v1216_v37 }
 0x2a4   : > { %v1220_v41 = vpop.f32.mrb[56].mxu0 }
 0x2a5   : > { %v1221_v43 = vadd.f32 %v1740_v35, %v1220_v41  ;;  %v2094_v44 = vpop.f32.mrb[57].mxu0 }
 0x2a7   : > { %1278 = vmax.xlane.f32.xlu1 %v1221_v43 }
 0x2a8   : > { %v1225_v46 = vpop.f32.mrb[58].mxu0 }
 0x2a9   : > { %v1226_v12 = vadd.f32 %v1740_v35, %v1225_v46  ;;  %v2097_v47 = vpop.f32.mrb[59].mxu0 }
 0x2ab   : > { %1280 = vmax.xlane.f32.xlu1 %v1226_v12 }
 0x2ac   : > { %v1230_v49 = vpop.f32.mrb[60].mxu0 }
 0x2ad   : > { %v1231_v50 = vadd.f32 %v1740_v35, %v1230_v49  ;;  %v2100_v51 = vpop.f32.mrb[61].mxu0 }
 0x2af   : > { %1282 = vmax.xlane.f32.xlu0 %v1231_v50 }
 0x2b0   : > { %v1235_v53 = vpop.f32.mrb[62].mxu0 }
 0x2b1   : > { %v1236_v45 = vadd.f32 %v1740_v35, %v1235_v53  ;;  %v2103_v55 = vpop.f32.mrb[63].mxu0 }
 0x2b3   : > { %1284 = vmax.xlane.f32.xlu1 %v1236_v45 }
 0x2b4   : > { %v1240_v33 = vpop.f32.mrb[64].mxu0 }
 0x2b5   : > { %v1241_v56 = vadd.f32 %v1740_v35, %v1240_v33  ;;  %v2106_v57 = vpop.f32.mrb[65].mxu0 }
 0x2b7   : > { %1286 = vmax.xlane.f32.xlu0 %v1241_v56 }
 0x2b8   : > { %v1245_v58 = vpop.f32.mrb[52].mxu1 }
 0x2b9   : > { %v1246_v59 = vadd.f32 %v1740_v35, %v1245_v58  ;;  %v2109_v60 = vpop.f32.mrb[53].mxu1 }
 0x2bb   : > { %1288 = vmax.xlane.f32.xlu1 %v1246_v59 }
 0x2bc   : > { %v1250_v63 = vpop.f32.mrb[54].mxu1 }
 0x2bd   : > { %v1251_v54 = vadd.f32 %v1740_v35, %v1250_v63  ;;  %v2112_v0 = vpop.f32.mrb[55].mxu1 }
 0x2bf   : > { %1290 = vmax.xlane.f32.xlu0 %v1251_v54 }
 0x2c0   : > { %v1255_v1 = vpop.f32.mrb[56].mxu1 }
 0x2c1   : > { %v3139_v2 = vadd.f32 %v1740_v35, %v1255_v1  ;;  %v2115_v3 = vpop.f32.mrb[57].mxu1 }
 0x2c3   : > { %1292 = vmax.xlane.f32.xlu1 %v3139_v2 }
 0x2c4   : > { %v1260_v42 = vpop.f32.mrb[58].mxu1 }
 0x2c5   : > { %v3142_v4 = vadd.f32 %v1740_v35, %v1260_v42  ;;  %v2118_v5 = vpop.f32.mrb[59].mxu1 }
 0x2c7   : > { %1294 = vmax.xlane.f32.xlu0 %v3142_v4 }
 0x2c8   : > { %v1265_v7 = vpop.f32.mrb[60].mxu1 }
 0x2c9   : > { %v3145_v8 = vadd.f32 %v1740_v35, %v1265_v7  ;;  %v2121_v9 = vpop.f32.mrb[61].mxu1 }
 0x2cb   : > { %1296 = vmax.xlane.f32.xlu1 %v3145_v8 }
 0x2cc   : > { %v1270_v62 = vpop.f32.mrb[62].mxu1 }
 0x2cd   : > { %v3148_v10 = vadd.f32 %v1740_v35, %v1270_v62  ;;  %v2124_v13 = vpop.f32.mrb[63].mxu1 }
 0x2cf   : > { %1298 = vmax.xlane.f32.xlu0 %v3148_v10 }
 0x32c   : > { %v1275_v11 = vpop.xlane.xlu0 %1274 }
 0x32d   : > { %v3151_v14 = vsub.f32 %v1211_v38, %v1275_v11 }
 0x32f   : > { %v1313_v52 = vmul.f32 1.442695, %v3151_v14 }
 0x330   : > { %v1277_v15 = vpop.xlane.xlu0 %1276 }
 0x331   : > { %2447 = vpow2.f32 %v1313_v52  ;;  %v3154_v17 = vsub.f32 %v1216_v37, %v1277_v15 }
 0x333   : > { %v1315_v18 = vmul.f32 1.442695, %v3154_v17 }
 0x334   : > { %v1279_v19 = vpop.xlane.xlu1 %1278 }
 0x335   : > { %2449 = vpow2.f32 %v1315_v18  ;;  %v3157_v20 = vsub.f32 %v1221_v43, %v1279_v19 }
 0x337   : > { %v1317_v21 = vmul.f32 1.442695, %v3157_v20 }
 0x338   : > { %v1281_v6 = vpop.xlane.xlu1 %1280 }
 0x339   : > { %2451 = vpow2.f32 %v1317_v21  ;;  %v3160_v48 = vsub.f32 %v1226_v12, %v1281_v6 }
 0x33b   : > { %v2448_v61 = vpop.eup %2447  ;;  %v1319_v22 = vmul.f32 1.442695, %v3160_v48 }
 0x33c   : > { %v1283_v23 = vpop.xlane.xlu0 %1282  ;;  %1339 = vadd.xlane.f32.xlu1 %v2448_v61 }
 0x33d   : > { %2453 = vpow2.f32 %v1319_v22  ;;  %v3163_v25 = vsub.f32 %v1231_v50, %v1283_v23 }
 0x33f   : > { %v2450_v26 = vpop.eup %2449  ;;  %v1321_v27 = vmul.f32 1.442695, %v3163_v25 }
 0x340   : > { %v1285_v28 = vpop.xlane.xlu1 %1284  ;;  %1341 = vadd.xlane.f32.xlu0 %v2450_v26 }
 0x341   : > { %2455 = vpow2.f32 %v1321_v27  ;;  %v3166_v30 = vsub.f32 %v1236_v45, %v1285_v28 }
 0x343   : > { %v2452_v16 = vpop.eup %2451  ;;  %v1323_v29 = vmul.f32 1.442695, %v3166_v30 }
 0x344   : > { %1343 = vadd.xlane.f32.xlu1 %v2452_v16  ;;  %v1287_v31 = vpop.xlane.xlu0 %1286 }
 0x345   : > { %2457 = vpow2.f32 %v1323_v29  ;;  %v3169_v32 = vsub.f32 %v1241_v56, %v1287_v31 }
 0x347   : > { %v2454_v34 = vpop.eup %2453  ;;  %v1325_v35 = vmul.f32 1.442695, %v3169_v32 }
 0x348   : > { %v1289_v36 = vpop.xlane.xlu1 %1288  ;;  %1345 = vadd.xlane.f32.xlu0 %v2454_v34 }
 0x349   : > { %2459 = vpow2.f32 %v1325_v35  ;;  %v3172_v38 = vsub.f32 %v1246_v59, %v1289_v36 }
 0x34b   : > { %v2456_v39 = vpop.eup %2455  ;;  %v1327_v40 = vmul.f32 1.442695, %v3172_v38 }
 0x34c   : > { %1347 = vadd.xlane.f32.xlu1 %v2456_v39  ;;  %v1291_v37 = vpop.xlane.xlu0 %1290 }
 0x34d   : > { %2461 = vpow2.f32 %v1327_v40  ;;  %v3175_v24 = vsub.f32 %v1251_v54, %v1291_v37 }
 0x34f   : > { %v2458_v41 = vpop.eup %2457  ;;  %v1329_v43 = vmul.f32 1.442695, %v3175_v24 }
 0x350   : > { %v1293_v44 = vpop.xlane.xlu1 %1292  ;;  %1349 = vadd.xlane.f32.xlu0 %v2458_v41 }
 0x351   : > { %2463 = vpow2.f32 %v1329_v43  ;;  %v3179_v46 = vsub.f32 %v3139_v2, %v1293_v44 }
 0x353   : > { %v2460_v12 = vpop.eup %2459  ;;  %v1331_v47 = vmul.f32 1.442695, %v3179_v46 }
 0x354   : > { %1351 = vadd.xlane.f32.xlu1 %v2460_v12  ;;  %v1295_v49 = vpop.xlane.xlu0 %1294 }
 0x355   : > { %2465 = vpow2.f32 %v1331_v47  ;;  %v3183_v50 = vsub.f32 %v3142_v4, %v1295_v49 }
 0x357   : > { %v2462_v51 = vpop.eup %2461  ;;  %v1333_v53 = vmul.f32 1.442695, %v3183_v50 }
 0x358   : > { %v1297_v45 = vpop.xlane.xlu1 %1296  ;;  %1353 = vadd.xlane.f32.xlu0 %v2462_v51 }
 0x359   : > { %2467 = vpow2.f32 %v1333_v53  ;;  %v3187_v55 = vsub.f32 %v3145_v8, %v1297_v45 }
 0x35b   : > { %v2464_v33 = vpop.eup %2463  ;;  %v1335_v56 = vmul.f32 1.442695, %v3187_v55 }
 0x35c   : > { %1355 = vadd.xlane.f32.xlu1 %v2464_v33  ;;  %v1299_v57 = vpop.xlane.xlu0 %1298 }
 0x35d   : > { %2469 = vpow2.f32 %v1335_v56  ;;  %v3191_v58 = vsub.f32 %v3148_v10, %v1299_v57 }
 0x35f   : > { %v2466_v59 = vpop.eup %2465  ;;  %v1337_v60 = vmul.f32 1.442695, %v3191_v58 }
 0x360   : > { %1357 = vadd.xlane.f32.xlu0 %v2466_v59 }
 0x361   : > { %2471 = vpow2.f32 %v1337_v60 }
 0x363   : > { %v2468_v63 = vpop.eup %2467 }
 0x364   : > { %1359 = vadd.xlane.f32.xlu1 %v2468_v63 }
 0x367   : > { %v2470_v54 = vpop.eup %2469 }
 0x368   : > { %1361 = vadd.xlane.f32.xlu0 %v2470_v54 }
 0x36b   : > { %v2472_v0 = vpop.eup %2471 }
 0x36c   : > { %1363 = vadd.xlane.f32.xlu1 %v2472_v0 }
 0x3c9   : > { %v1340_v1 = vpop.xlane.xlu1 %1339 }
 0x3ca   : > { %2473 = vlog2.f32 %v1340_v1 }
 0x3cd   : > { %v1342_v2 = vpop.xlane.xlu0 %1341 }
 0x3ce   : > { %2475 = vlog2.f32 %v1342_v2 }
 0x3d1   : > { %v1344_v3 = vpop.xlane.xlu1 %1343 }
 0x3d2   : > { %2477 = vlog2.f32 %v1344_v3 }
 0x3d4   : > { %v2474_v42 = vpop.eup %2473 }
 0x3d5   : > { %v1366_v4 = vmul.f32 0.6931472, %v2474_v42  ;;  %v1346_v5 = vpop.xlane.xlu0 %1345 }
 0x3d6   : > { %2479 = vlog2.f32 %v1346_v5 }
 0x3d7   : > { %v1391_v7 = vsub.f32 %v3151_v14, %v1366_v4 }
 0x3d8   : > { %v2476_v8 = vpop.eup %2475 }
 0x3d9   : > { %1405 = vst.msk [vmem:[%s3196_s17] sm:$0xff] %vm1404_vm2, %v1391_v7  ;;  %v1368_v9 = vmul.f32 0.6931472, %v2476_v8  ;;  %v1348_v62 = vpop.xlane.xlu1 %1347 }
 0x3da   : > { %2481 = vlog2.f32 %v1348_v62 }
 0x3db   : > { %v1392_v10 = vsub.f32 %v3154_v17, %v1368_v9 }
 0x3dc   : > { %v2478_v13 = vpop.eup %2477 }
 0x3dd   : > { %1406 = vst.msk [vmem:[%s3196_s17 + $0x8] sm:$0xff] %vm1404_vm2, %v1392_v10  ;;  %v1370_v11 = vmul.f32 0.6931472, %v2478_v13  ;;  %v1350_v52 = vpop.xlane.xlu0 %1349 }
 0x3de   : > { %2483 = vlog2.f32 %v1350_v52 }
 0x3df   : > { %v1393_v14 = vsub.f32 %v3157_v20, %v1370_v11 }
 0x3e0   : > { %v2480_v15 = vpop.eup %2479 }
 0x3e1   : > { %1407 = vst.msk [vmem:[%s3196_s17 + $0x10] sm:$0xff] %vm1404_vm2, %v1393_v14  ;;  %v1372_v18 = vmul.f32 0.6931472, %v2480_v15  ;;  %v1352_v19 = vpop.xlane.xlu1 %1351 }
 0x3e2   : > { %2485 = vlog2.f32 %v1352_v19 }
 0x3e3   : > { %v1394_v21 = vsub.f32 %v3160_v48, %v1372_v18 }
 0x3e4   : > { %v2482_v6 = vpop.eup %2481 }
 0x3e5   : > { %1408 = vst.msk [vmem:[%s3196_s17 + $0x18] sm:$0xff] %vm1404_vm2, %v1394_v21  ;;  %v1374_v17 = vmul.f32 0.6931472, %v2482_v6  ;;  %v1354_v61 = vpop.xlane.xlu0 %1353 }
 0x3e6   : > { %2487 = vlog2.f32 %v1354_v61 }
 0x3e7   : > { %v1395_v22 = vsub.f32 %v3163_v25, %v1374_v17 }
 0x3e8   : > { %v2484_v23 = vpop.eup %2483 }
 0x3e9   : > { %1409 = vst.msk [vmem:[%s3196_s17 + $0x20] sm:$0xff] %vm1404_vm2, %v1395_v22  ;;  %v1376_v20 = vmul.f32 0.6931472, %v2484_v23  ;;  %v1356_v26 = vpop.xlane.xlu1 %1355 }
 0x3ea   : > { %2489 = vlog2.f32 %v1356_v26 }
 0x3eb   : > { %v1396_v27 = vsub.f32 %v3166_v30, %v1376_v20 }
 0x3ec   : > { %v2486_v28 = vpop.eup %2485 }
 0x3ed   : > { %1410 = vst.msk [vmem:[%s3196_s17 + $0x28] sm:$0xff] %vm1404_vm2, %v1396_v27  ;;  %v1378_v48 = vmul.f32 0.6931472, %v2486_v28  ;;  %v1358_v16 = vpop.xlane.xlu0 %1357 }
 0x3ee   : > { %2491 = vlog2.f32 %v1358_v16 }
 0x3ef   : > { %v1397_v29 = vsub.f32 %v3169_v32, %v1378_v48 }
 0x3f0   : > { %v2488_v31 = vpop.eup %2487 }
 0x3f1   : > { %1411 = vst.msk [vmem:[%s3196_s17 + $0x30] sm:$0xff] %vm1404_vm2, %v1397_v29  ;;  %v1380_v25 = vmul.f32 0.6931472, %v2488_v31  ;;  %v1360_v34 = vpop.xlane.xlu1 %1359 }
 0x3f2   : > { %2493 = vlog2.f32 %v1360_v34 }
 0x3f3   : > { %v1398_v35 = vsub.f32 %v3172_v38, %v1380_v25 }
 0x3f4   : > { %v2490_v36 = vpop.eup %2489 }
 0x3f5   : > { %1412 = vst.msk [vmem:[%s3196_s17 + $0x38] sm:$0xff] %vm1404_vm2, %v1398_v35  ;;  %v1382_v30 = vmul.f32 0.6931472, %v2490_v36  ;;  %v1362_v39 = vpop.xlane.xlu0 %1361 }
 0x3f6   : > { %2495 = vlog2.f32 %v1362_v39 }
 0x3f7   : > { %v1399_v40 = vsub.f32 %v3175_v24, %v1382_v30 }
 0x3f8   : > { %v2492_v32 = vpop.eup %2491 }
 0x3f9   : > { %1413 = vst.msk [vmem:[%s3196_s17 + $0x40] sm:$0xff] %vm1404_vm2, %v1399_v40  ;;  %v1384_v37 = vmul.f32 0.6931472, %v2492_v32  ;;  %v1364_v41 = vpop.xlane.xlu1 %1363 }
 0x3fa   : > { %2497 = vlog2.f32 %v1364_v41 }
 0x3fb   : > { %v1400_v43 = vsub.f32 %v3179_v46, %v1384_v37 }
 0x3fc   : > { %v2494_v38 = vpop.eup %2493 }
 0x3fd   : > { %1414 = vst.msk [vmem:[%s3196_s17 + $0x48] sm:$0xff] %vm1404_vm2, %v1400_v43  ;;  %v1386_v44 = vmul.f32 0.6931472, %v2494_v38 }
 0x3ff   : > { %v1401_v12 = vsub.f32 %v3183_v50, %v1386_v44 }
 0x400   : > { %v2496_v47 = vpop.eup %2495 }
 0x401   : > { %1415 = vst.msk [vmem:[%s3196_s17 + $0x50] sm:$0xff] %vm1404_vm2, %v1401_v12  ;;  %v1388_v24 = vmul.f32 0.6931472, %v2496_v47 }
 0x403   : > { %v1402_v49 = vsub.f32 %v3187_v55, %v1388_v24  ;;  %1424 = sbr.rel (!%p3347_p6) target bundleno = 1095 (0x447), region = 56 }
 0x404   : > { %v2498_v51 = vpop.eup %2497 }
 0x405   : > { %1416 = vst.msk [vmem:[%s3196_s17 + $0x58] sm:$0xff] %vm1404_vm2, %v1402_v49  ;;  %v1390_v53 = vmul.f32 0.6931472, %v2498_v51 }
 0x407   : > { %v1403_v45 = vsub.f32 %v3191_v58, %v1390_v53 }
 0x409   : > { %1417 = vst.msk [vmem:[%s3196_s17 + $0x60] sm:$0xff] %vm1404_vm2, %v1403_v45 }
 0x40a   : > { %s3358_s11 = smov (!%p1427_p7, %s1426_s11), 13 }
 0x40b   : > { %s1741_s10 = sshll.u32 %s3358_s11, 7 }
 0x40c   : > { %p1744_p9 = scmp.eq.s32.totalorder %s1741_s10, 0 }
 0x40d   : > { %2499 = sdivrem.u32 (!%p1744_p9), %s3358_s11, 13 }
 0x40e   : > { %1435 = sbr.rel (%p1744_p9) target bundleno = 1095 (0x447), region = 60 }
 0x416   : > { %s3249_s29 = spop.drf %2499 }
 0x417   : > { %p1745_p12 = scmp.le.s32.totalorder %s3249_s29, 0 }
 0x418   : > { %s3348_s22 = smov (!%p1745_p12), %s3243_s14  ;;  %s3349_s27 = smov (!%p1745_p12), %s3196_s17 }
 0x419   : > { %1648 = sbr.rel (%p1745_p12) target bundleno = 1066 (0x42a), region = 142  ;;  %s3258_s25 = smov (!%p1745_p12), 0  }
 0x41a   : > { %s3260_s16 = smov (!%p1745_p12), 0  }
 0x420 LB: >> { %v1523_v46 = vld [vmem:[%s2665_s27] sm:$0xff]  ;;  %v1525_v50 = vld [vmem:[%s2665_s27 + $0x8] sm:$0xff]  ;;  %v1527_v55 = vld [vmem:[%s2665_s27 + $0x10] sm:$0xff]  ;;  %s1549_s7 = sadd.s32 1, %s2669_s25  ;;  %s1517_s16 = sadd.s32 1, %s2673_s16   ;;  %s2673_s16 = sphi %s3260_s16, %s1517_s16   ;;  %s2669_s25 = sphi %s3258_s25, %s3350_s25   ;;  %s2665_s27 = sphi %s3349_s27, %s1554_s27   ;;  %s2661_s22 = sphi %s3348_s22, %s1555_s22  }
 0x421   : >> { %1524 = vst [vmem:[%s2661_s22] sm:$0xff] %v1523_v46  ;;  %1526 = vst [vmem:[%s2661_s22 + $0x8] sm:$0xff] %v1525_v50  ;;  %v1529_v33 = vld [vmem:[%s2665_s27 + $0x18] sm:$0xff]  ;;  %v1531_v56 = vld [vmem:[%s2665_s27 + $0x20] sm:$0xff]  ;;  %p1550_p0 = scmp.ge.s32.totalorder %s1549_s7, %s3249_s29  ;;  %p1516_p4 = scmp.ge.s32.totalorder %s1517_s16, %s3249_s29 }
 0x422   : >> { %1528 = vst [vmem:[%s2661_s22 + $0x10] sm:$0xff] %v1527_v55  ;;  %v1533_v57 = vld [vmem:[%s2665_s27 + $0x28] sm:$0xff]  ;;  %1530 = vst [vmem:[%s2661_s22 + $0x18] sm:$0xff] %v1529_v33  ;;  %v1535_v58 = vld [vmem:[%s2665_s27 + $0x30] sm:$0xff] }
 0x423   : >> { %1532 = vst [vmem:[%s2661_s22 + $0x20] sm:$0xff] %v1531_v56  ;;  %1534 = vst [vmem:[%s2661_s22 + $0x28] sm:$0xff] %v1533_v57  ;;  %v1537_v59 = vld [vmem:[%s2665_s27 + $0x38] sm:$0xff]  ;;  %v1539_v60 = vld [vmem:[%s2665_s27 + $0x40] sm:$0xff]  ;;  %s3360_s7 = smov (%p1550_p0, %s1549_s7), 0  ;;  %1519 = sbr.rel (!%p1516_p4) target bundleno = 1056 (0x420), region = 148 }
 0x424   : >> { %1536 = vst [vmem:[%s2661_s22 + $0x30] sm:$0xff] %v1535_v58  ;;  %1538 = vst [vmem:[%s2661_s22 + $0x38] sm:$0xff] %v1537_v59  ;;  %v1541_v63 = vld [vmem:[%s2665_s27 + $0x48] sm:$0xff]  ;;  %v1543_v54 = vld [vmem:[%s2665_s27 + $0x50] sm:$0xff]  ;;  %s1552_s18 = smul.u32 104, %s3360_s7  ;;  %s3350_s25 = smov %s3360_s7 }
 0x425   : >> { %1540 = vst [vmem:[%s2661_s22 + $0x40] sm:$0xff] %v1539_v60  ;;  %v1545_v0 = vld [vmem:[%s2665_s27 + $0x58] sm:$0xff]  ;;  %1542 = vst [vmem:[%s2661_s22 + $0x48] sm:$0xff] %v1541_v63  ;;  %v1547_v1 = vld [vmem:[%s2665_s27 + $0x60] sm:$0xff] }
 0x426   : >> { %1544 = vst [vmem:[%s2661_s22 + $0x50] sm:$0xff] %v1543_v54  ;;  %1546 = vst [vmem:[%s2661_s22 + $0x58] sm:$0xff] %v1545_v0  ;;  %s1554_s27 = scalar_lea.vmem %s3196_s17, %s1552_s18 [#allocation7]  }
 0x427   : >> { %1548 = vst [vmem:[%s2661_s22 + $0x60] sm:$0xff] %v1547_v1  ;;  %s1555_s22 = scalar_lea.vmem %s3243_s14, %s1552_s18  }
 0x42a PF: > { %2501 = sdivrem.u32 %s3358_s11, 13 }
 0x42b   : > { %s1746_s6 = smul.u32 104, %s3249_s29 }
 0x42d   : > { %s1560_s28 = scalar_lea.vmem %s3196_s17, %s1746_s6 [#allocation7]   ;;  %s1562_s30 = scalar_lea.vmem %s3243_s14, %s1746_s6  }
 0x433   : > { %s2502_s8 = spop.drf %2501 }
 0x434   : > { %p1748_p1 = scmp.le.s32.totalorder %s2502_s8, 0 }
 0x435   : > { %s2675_s15 = smov (!%p1748_p1), %s1562_s30   ;;  %s2679_s24 = smov (!%p1748_p1), %s1560_s28  }
 0x436   : > { %1662 = sbr.rel (%p1748_p1) target bundleno = 1095 (0x447), region = 153  ;;  %s2683_s21 = smov (!%p1748_p1), 0  }
 0x437   : > { %s2687_s9 = smov (!%p1748_p1), 0  }
 0x43d LB: >> { %v1572_v2 = vld [vmem:[%s2681_s24] sm:$0xff]  ;;  %s1574_s12 = sadd.s32 1, %s2685_s21  ;;  %s1566_s9 = sadd.s32 1, %s2689_s9   ;;  %s2689_s9 = sphi %s2687_s9, %s1566_s9   ;;  %s2685_s21 = sphi %s2683_s21, %s2684_s21   ;;  %s2681_s24 = sphi %s2679_s24, %s1579_s24   ;;  %s2677_s15 = sphi %s2675_s15, %s1580_s15  }
 0x43e   : >> { %1573 = vst [vmem:[%s2677_s15] sm:$0xff] %v1572_v2  ;;  %p1575_p5 = scmp.ge.s32.totalorder %s1574_s12, %s2502_s8  ;;  %p1565_p8 = scmp.ge.s32.totalorder %s1566_s9, %s2502_s8 }
 0x440   : >> { %s3362_s12 = smov (%p1575_p5, %s1574_s12), 0  ;;  %1568 = sbr.rel (!%p1565_p8) target bundleno = 1085 (0x43d), region = 159 }
 0x441   : >> { %s1749_s17 = sshll.u32 %s3362_s12, 3  ;;  %s2684_s21 = smov %s3362_s12  }
 0x442   : >> { %s1579_s24 = scalar_lea.vmem %s1560_s28, %s1749_s17 [#allocation7]   ;;  %s1580_s15 = scalar_lea.vmem %s1562_s30, %s1749_s17  }
 0x447 PF: > { %p16_p11 = scmp.ge.s32.totalorder %s2753_s23, 4   ;;  %s3351_s18 = smov %s2649_s19 }
 0x448   : > { %s3352_s19 = smov %s2653_s20  ;;  %s3353_s20 = smov %s2763_s26 }
 0x449   : > { %s3354_s21 = smov %s2753_s23  ;;  %18 = sbr.rel (!%p16_p11) target bundleno = 4 (0x4), region = 170 }
 0x450   :  { %1596 = vsyncpa [#allocation3], 1 }
 0x451   :  { %1598 = vsyncpa [#allocation3 + $0x1], 1 }
 0x452   :  { %1599 = vsyncpa [#allocation5], 1 }

</bundles_post_ra>
